<compile_context>
chip_gen: v7x
topology: tpu7x:2x2x1
jax: 0.10.0
libtpu: 0.0.40
codegen_flags: <defaults>
</compile_context>

<pallas_src>
import functools

import jax
import jax.numpy as jnp
import numpy as np
from jax import lax
from jax.experimental import pallas as pl
from jax.experimental.pallas import tpu as pltpu


def _round_up(x, m):
    return (x + m - 1) // m * m


def _pick_row_tile(ho, wo, target_rows=512):
    """Largest divisor of Ho such that the tile's matmul M-dim (TH*Wo) <= target."""
    best = 1
    for d in range(1, ho + 1):
        if ho % d == 0 and d * wo <= target_rows:
            best = d
    return best


def _conv_bn_relu_kernel(x_ref, w_ref, scale_ref, bias_ref, o_ref, acc_ref, *,
                         kh_size, kw_size, stride):
    # x_ref:     (1, Hp, Wp, Cin)      whole padded image of one batch element
    #                                  (VMEM-resident across row/Cout tiles)
    # w_ref:     (KH*KW, Cin, TC)      per-tap weights for this Cout tile
    # scale_ref: (1, TC)  f32          folded BN scale = gamma / sqrt(var+eps)
    # bias_ref:  (1, TC)  f32          folded BN bias  = beta - mean*scale
    # o_ref:     (1, TH, Wo, TC)       output tile (lane-dense channel tile)
    # acc_ref:   (TH*Wo, TC) f32       VMEM accumulator scratch
    _, th, wo, tc = o_ref.shape
    cin = x_ref.shape[-1]
    r = pl.program_id(1)

    rows_in = (th - 1) * stride + kh_size                 # halo rows for this tile
    row0 = pl.multiple_of(r * (th * stride), th * stride)
    xt = x_ref[0, pl.ds(row0, rows_in), :, :]             # (rows_in, Wp, Cin)

    # Shifted-window (im2col-free) conv: KH*KW matmuls accumulated in f32.
    for kh in range(kh_size):
        for kw in range(kw_size):
            k = kh * kw_size + kw
            patch = xt[kh:kh + (th - 1) * stride + 1:stride,
                       kw:kw + (wo - 1) * stride + 1:stride, :]   # (TH, Wo, Cin)
            contrib = jnp.dot(patch.reshape(th * wo, cin), w_ref[k],
                              preferred_element_type=jnp.float32)
            if k == 0:
                acc_ref[...] = contrib
            else:
                acc_ref[...] += contrib

    # Fused BN (eval) + ReLU epilogue, f32 math, cast only at the store.
    y = acc_ref[...] * scale_ref[...] + bias_ref[...]
    y = jnp.maximum(y, 0.0)
    o_ref[0] = y.reshape(th, wo, tc).astype(o_ref.dtype)


def conv_layer_forward(x_nchw, weight_oihw, gamma, beta, running_mean,
                       running_var, *, stride=1, padding=0, eps=1e-5):
    """ConvLayer.forward: conv2d(bias=False) -> BatchNorm2d(eval) -> ReLU."""
    n, cin, h, w = x_nchw.shape
    cout, cin_w, kh, kw = weight_oihw.shape
    assert cin_w == cin, "groups != 1 not supported"  # TODO(synk): grouped conv

    ho = (h + 2 * padding - kh) // stride + 1
    wo = (w + 2 * padding - kw) // stride + 1
    hp, wp = h + 2 * padding, w + 2 * padding

    # Channel/spatial tiling.
    cout_pad = _round_up(cout, 128)                 # lane-dense output channels
    tc = 256 if cout_pad % 256 == 0 else 128        # 256-wide MXU tile when possible
    th = _pick_row_tile(ho, wo)                     # output-row tile

    # NCHW -> NHWC + spatial zero-padding (glue, plain JAX).
    x_nhwc = jnp.transpose(x_nchw, (0, 2, 3, 1))
    x_pad = jnp.pad(x_nhwc,
                    ((0, 0), (padding, padding), (padding, padding), (0, 0)))

    # OIHW -> (KH*KW, Cin, Cout_pad); per-tap weights indexed on the leading axis.
    w_taps = jnp.transpose(weight_oihw, (2, 3, 1, 0)).reshape(kh * kw, cin, cout)
    w_taps = jnp.pad(w_taps, ((0, 0), (0, 0), (0, cout_pad - cout)))

    # Fold BN (inference) into per-channel scale/bias (f32), zero-padded tail.
    scale = (gamma.astype(jnp.float32) /
             jnp.sqrt(running_var.astype(jnp.float32) + eps))
    bias = beta.astype(jnp.float32) - running_mean.astype(jnp.float32) * scale
    scale_p = jnp.pad(scale, (0, cout_pad - cout)).reshape(1, cout_pad)
    bias_p = jnp.pad(bias, (0, cout_pad - cout)).reshape(1, cout_pad)

    kernel = functools.partial(_conv_bn_relu_kernel,
                               kh_size=kh, kw_size=kw, stride=stride)

    # Explicit VMEM budget (double buffers for pipelined operands + scratch).
    xsz = x_pad.dtype.itemsize
    wsz = w_taps.dtype.itemsize
    est = (2 * hp * wp * cin * xsz          # input image (resident, 2 bufs)
           + 2 * kh * kw * cin * tc * wsz   # weight tile
           + 2 * th * wo * tc * xsz         # output tile
           + th * wo * tc * 4               # f32 accumulator scratch
           + 4 * 2 * tc * 4                 # scale / bias tiles
           + (2 << 20))                     # headroom
    vmem_limit = int(min(max(est, 16 * 1024 * 1024), 128 * 1024 * 1024))

    out_nhwc = pl.pallas_call(
        kernel,
        out_shape=jax.ShapeDtypeStruct((n, ho, wo, cout_pad), x_nchw.dtype),
        grid_spec=pltpu.PrefetchScalarGridSpec(
            num_scalar_prefetch=0,
            grid=(n, ho // th, cout_pad // tc),
            in_specs=[
                pl.BlockSpec((1, hp, wp, cin), lambda b, r, c: (b, 0, 0, 0)),
                pl.BlockSpec((kh * kw, cin, tc), lambda b, r, c: (0, 0, c)),
                pl.BlockSpec((1, tc), lambda b, r, c: (0, c)),
                pl.BlockSpec((1, tc), lambda b, r, c: (0, c)),
            ],
            out_specs=pl.BlockSpec((1, th, wo, tc), lambda b, r, c: (b, r, 0, c)),
            scratch_shapes=[pltpu.VMEM((th * wo, tc), jnp.float32)],
        ),
        compiler_params=pltpu.CompilerParams(
            dimension_semantics=("parallel", "parallel", "parallel"),
            vmem_limit_bytes=vmem_limit),
    )(x_pad, w_taps, scale_p, bias_p)

    # Drop the channel padding, NHWC -> NCHW.
    out_nhwc = out_nhwc[..., :cout]
    return jnp.transpose(out_nhwc, (0, 3, 1, 2))


def _reference(x_nchw, weight_oihw, gamma, beta, running_mean, running_var,
               *, stride, padding, eps=1e-5):
    y = lax.conv_general_dilated(
        x_nchw, weight_oihw,
        window_strides=(stride, stride),
        padding=[(padding, padding), (padding, padding)],
        dimension_numbers=("NCHW", "OIHW", "NCHW"))
    scale = gamma / jnp.sqrt(running_var + eps)
    bias = beta - running_mean * scale
    y = y * scale[None, :, None, None] + bias[None, :, None, None]
    return jnp.maximum(y, 0.0)


def _run_case(key, n, cin, cout, h, w, k, stride, padding):
    kx, kw_, kg, kb, km, kv = jax.random.split(key, 6)
    x = jax.random.normal(kx, (n, cin, h, w), dtype=jnp.float32)
    weight = jax.random.normal(kw_, (cout, cin, k, k), dtype=jnp.float32) * 0.1
    gamma = 1.0 + 0.1 * jax.random.normal(kg, (cout,), dtype=jnp.float32)
    beta = 0.1 * jax.random.normal(kb, (cout,), dtype=jnp.float32)
    rmean = 0.1 * jax.random.normal(km, (cout,), dtype=jnp.float32)
    rvar = jnp.abs(jax.random.normal(kv, (cout,), dtype=jnp.float32)) + 0.5

    out = conv_layer_forward(x, weight, gamma, beta, rmean, rvar,
                             stride=stride, padding=padding)
    out = jax.block_until_ready(out)

    ref = _reference(x, weight, gamma, beta, rmean, rvar,
                     stride=stride, padding=padding)
    np.testing.assert_allclose(np.asarray(out), np.asarray(ref),
                               rtol=1e-4, atol=1e-4)


if __name__ == "__main__":
    key = jax.random.PRNGKey(0)
    k1, k2 = jax.random.split(key)
    # ConvLayer(4, 8, 3, stride=1, padding=1) on 2x4x16x16
    _run_case(k1, n=2, cin=4, cout=8, h=16, w=16, k=3, stride=1, padding=1)
    # ConvLayer(3, 16, 3, stride=2, padding=1) — exercises strided halo tiling.
    _run_case(k2, n=2, cin=3, cout=16, h=16, w=16, k=3, stride=2, padding=1)
    print("KERNEL_OK")
</pallas_src>

<mosaic_0001>
module attributes {stable_mosaic.version = 11 : i64} {
  func.func @_conv_bn_relu_kernel(%arg0: i32, %arg1: i32, %arg2: i32, %arg3: memref<1x18x18x4xf32, #tpu.memory_space<vmem>>, %arg4: memref<9x4x128xf32, #tpu.memory_space<vmem>>, %arg5: memref<1x128xf32, #tpu.memory_space<vmem>>, %arg6: memref<1x128xf32, #tpu.memory_space<vmem>>, %arg7: memref<1x16x16x128xf32, #tpu.memory_space<vmem>>, %arg8: memref<256x128xf32, #tpu.memory_space<vmem>>) attributes {dimension_semantics = [#tpu.dimension_semantics<parallel>, #tpu.dimension_semantics<parallel>, #tpu.dimension_semantics<parallel>], iteration_bounds = array<i64: 2, 1, 1>, scalar_prefetch = 0 : i64, scratch_operands = 1 : i64, tpu.core_type = #tpu.core_type<tc>, window_params = [{transform_indices = @transform_0, window_bounds = array<i64: 1, 18, 18, 4>}, {transform_indices = @transform_1, window_bounds = array<i64: 9, 4, 128>}, {transform_indices = @transform_2, window_bounds = array<i64: 1, 128>}, {transform_indices = @transform_3, window_bounds = array<i64: 1, 128>}, {transform_indices = @transform_4, window_bounds = array<i64: 1, 16, 16, 128>}]} {
    %c16_i32 = arith.constant 16 : i32
    %0 = arith.muli %arg1, %c16_i32 : i32
    %1 = tpu.assume_multiple %0, 16 : i32
    %c0 = arith.constant 0 : index
    %2 = arith.index_cast %1 : i32 to index
    %c0_0 = arith.constant 0 : index
    %c0_1 = arith.constant 0 : index
    %3 = vector.load %arg3[%c0, %2, %c0_0, %c0_1] : memref<1x18x18x4xf32, #tpu.memory_space<vmem>>, vector<1x18x18x4xf32>
    %4 = vector.shape_cast %3 : vector<1x18x18x4xf32> to vector<18x18x4xf32>
    %5 = vector.extract_strided_slice %4 {offsets = [0, 0, 0], sizes = [16, 16, 4], strides = [1, 1, 1]} : vector<18x18x4xf32> to vector<16x16x4xf32>
    %6 = vector.shape_cast %5 : vector<16x16x4xf32> to vector<256x4xf32>
    %c0_2 = arith.constant 0 : index
    %c0_3 = arith.constant 0 : index
    %c0_4 = arith.constant 0 : index
    %7 = vector.load %arg4[%c0_2, %c0_3, %c0_4] : memref<9x4x128xf32, #tpu.memory_space<vmem>>, vector<1x4x128xf32>
    %8 = vector.shape_cast %7 : vector<1x4x128xf32> to vector<4x128xf32>
    %cst = arith.constant dense<0.000000e+00> : vector<256x128xf32>
    %9 = tpu.matmul %6, %8, %cst {dimension_numbers = #tpu.dot_dimension_numbers<[1], [0], [0], [1], [0, 0, 1, 1], [], []>} : vector<256x4xf32>, vector<4x128xf32>, vector<256x128xf32> -> vector<256x128xf32>
    %c0_5 = arith.constant 0 : index
    %c0_6 = arith.constant 0 : index
    %10 = vector.load %arg8[%c0_5, %c0_6] : memref<256x128xf32, #tpu.memory_space<vmem>>, vector<256x128xf32>
    tpu.vector_store %arg8[%c0_5, %c0_6], %9 {strides = array<i32>} : memref<256x128xf32, #tpu.memory_space<vmem>>, vector<256x128xf32>,
    %11 = vector.extract_strided_slice %4 {offsets = [0, 1, 0], sizes = [16, 16, 4], strides = [1, 1, 1]} : vector<18x18x4xf32> to vector<16x16x4xf32>
    %12 = vector.shape_cast %11 : vector<16x16x4xf32> to vector<256x4xf32>
    %c1 = arith.constant 1 : index
    %c0_7 = arith.constant 0 : index
    %c0_8 = arith.constant 0 : index
    %13 = vector.load %arg4[%c1, %c0_7, %c0_8] : memref<9x4x128xf32, #tpu.memory_space<vmem>>, vector<1x4x128xf32>
    %14 = vector.shape_cast %13 : vector<1x4x128xf32> to vector<4x128xf32>
    %cst_9 = arith.constant dense<0.000000e+00> : vector<256x128xf32>
    %15 = tpu.matmul %12, %14, %cst_9 {dimension_numbers = #tpu.dot_dimension_numbers<[1], [0], [0], [1], [0, 0, 1, 1], [], []>} : vector<256x4xf32>, vector<4x128xf32>, vector<256x128xf32> -> vector<256x128xf32>
    %c0_10 = arith.constant 0 : index
    %c0_11 = arith.constant 0 : index
    %16 = vector.load %arg8[%c0_10, %c0_11] : memref<256x128xf32, #tpu.memory_space<vmem>>, vector<256x128xf32>
    %17 = arith.addf %16, %15 : vector<256x128xf32>
    %c0_12 = arith.constant 0 : index
    %c0_13 = arith.constant 0 : index
    %18 = vector.load %arg8[%c0_12, %c0_13] : memref<256x128xf32, #tpu.memory_space<vmem>>, vector<256x128xf32>
    tpu.vector_store %arg8[%c0_12, %c0_13], %17 {strides = array<i32>} : memref<256x128xf32, #tpu.memory_space<vmem>>, vector<256x128xf32>,
    %19 = vector.extract_strided_slice %4 {offsets = [0, 2, 0], sizes = [16, 16, 4], strides = [1, 1, 1]} : vector<18x18x4xf32> to vector<16x16x4xf32>
    %20 = vector.shape_cast %19 : vector<16x16x4xf32> to vector<256x4xf32>
    %c2 = arith.constant 2 : index
    %c0_14 = arith.constant 0 : index
    %c0_15 = arith.constant 0 : index
    %21 = vector.load %arg4[%c2, %c0_14, %c0_15] : memref<9x4x128xf32, #tpu.memory_space<vmem>>, vector<1x4x128xf32>
    %22 = vector.shape_cast %21 : vector<1x4x128xf32> to vector<4x128xf32>
    %cst_16 = arith.constant dense<0.000000e+00> : vector<256x128xf32>
    %23 = tpu.matmul %20, %22, %cst_16 {dimension_numbers = #tpu.dot_dimension_numbers<[1], [0], [0], [1], [0, 0, 1, 1], [], []>} : vector<256x4xf32>, vector<4x128xf32>, vector<256x128xf32> -> vector<256x128xf32>
    %c0_17 = arith.constant 0 : index
    %c0_18 = arith.constant 0 : index
    %24 = vector.load %arg8[%c0_17, %c0_18] : memref<256x128xf32, #tpu.memory_space<vmem>>, vector<256x128xf32>
    %25 = arith.addf %24, %23 : vector<256x128xf32>
    %c0_19 = arith.constant 0 : index
    %c0_20 = arith.constant 0 : index
    %26 = vector.load %arg8[%c0_19, %c0_20] : memref<256x128xf32, #tpu.memory_space<vmem>>, vector<256x128xf32>
    tpu.vector_store %arg8[%c0_19, %c0_20], %25 {strides = array<i32>} : memref<256x128xf32, #tpu.memory_space<vmem>>, vector<256x128xf32>,
    %27 = vector.extract_strided_slice %4 {offsets = [1, 0, 0], sizes = [16, 16, 4], strides = [1, 1, 1]} : vector<18x18x4xf32> to vector<16x16x4xf32>
    %28 = vector.shape_cast %27 : vector<16x16x4xf32> to vector<256x4xf32>
    %c3 = arith.constant 3 : index
    %c0_21 = arith.constant 0 : index
    %c0_22 = arith.constant 0 : index
    %29 = vector.load %arg4[%c3, %c0_21, %c0_22] : memref<9x4x128xf32, #tpu.memory_space<vmem>>, vector<1x4x128xf32>
    %30 = vector.shape_cast %29 : vector<1x4x128xf32> to vector<4x128xf32>
    %cst_23 = arith.constant dense<0.000000e+00> : vector<256x128xf32>
    %31 = tpu.matmul %28, %30, %cst_23 {dimension_numbers = #tpu.dot_dimension_numbers<[1], [0], [0], [1], [0, 0, 1, 1], [], []>} : vector<256x4xf32>, vector<4x128xf32>, vector<256x128xf32> -> vector<256x128xf32>
    %c0_24 = arith.constant 0 : index
    %c0_25 = arith.constant 0 : index
    %32 = vector.load %arg8[%c0_24, %c0_25] : memref<256x128xf32, #tpu.memory_space<vmem>>, vector<256x128xf32>
    %33 = arith.addf %32, %31 : vector<256x128xf32>
    %c0_26 = arith.constant 0 : index
    %c0_27 = arith.constant 0 : index
    %34 = vector.load %arg8[%c0_26, %c0_27] : memref<256x128xf32, #tpu.memory_space<vmem>>, vector<256x128xf32>
    tpu.vector_store %arg8[%c0_26, %c0_27], %33 {strides = array<i32>} : memref<256x128xf32, #tpu.memory_space<vmem>>, vector<256x128xf32>,
    %35 = vector.extract_strided_slice %4 {offsets = [1, 1, 0], sizes = [16, 16, 4], strides = [1, 1, 1]} : vector<18x18x4xf32> to vector<16x16x4xf32>
    %36 = vector.shape_cast %35 : vector<16x16x4xf32> to vector<256x4xf32>
    %c4 = arith.constant 4 : index
    %c0_28 = arith.constant 0 : index
    %c0_29 = arith.constant 0 : index
    %37 = vector.load %arg4[%c4, %c0_28, %c0_29] : memref<9x4x128xf32, #tpu.memory_space<vmem>>, vector<1x4x128xf32>
    %38 = vector.shape_cast %37 : vector<1x4x128xf32> to vector<4x128xf32>
    %cst_30 = arith.constant dense<0.000000e+00> : vector<256x128xf32>
    %39 = tpu.matmul %36, %38, %cst_30 {dimension_numbers = #tpu.dot_dimension_numbers<[1], [0], [0], [1], [0, 0, 1, 1], [], []>} : vector<256x4xf32>, vector<4x128xf32>, vector<256x128xf32> -> vector<256x128xf32>
    %c0_31 = arith.constant 0 : index
    %c0_32 = arith.constant 0 : index
    %40 = vector.load %arg8[%c0_31, %c0_32] : memref<256x128xf32, #tpu.memory_space<vmem>>, vector<256x128xf32>
    %41 = arith.addf %40, %39 : vector<256x128xf32>
    %c0_33 = arith.constant 0 : index
    %c0_34 = arith.constant 0 : index
    %42 = vector.load %arg8[%c0_33, %c0_34] : memref<256x128xf32, #tpu.memory_space<vmem>>, vector<256x128xf32>
    tpu.vector_store %arg8[%c0_33, %c0_34], %41 {strides = array<i32>} : memref<256x128xf32, #tpu.memory_space<vmem>>, vector<256x128xf32>,
    %43 = vector.extract_strided_slice %4 {offsets = [1, 2, 0], sizes = [16, 16, 4], strides = [1, 1, 1]} : vector<18x18x4xf32> to vector<16x16x4xf32>
    %44 = vector.shape_cast %43 : vector<16x16x4xf32> to vector<256x4xf32>
    %c5 = arith.constant 5 : index
    %c0_35 = arith.constant 0 : index
    %c0_36 = arith.constant 0 : index
    %45 = vector.load %arg4[%c5, %c0_35, %c0_36] : memref<9x4x128xf32, #tpu.memory_space<vmem>>, vector<1x4x128xf32>
    %46 = vector.shape_cast %45 : vector<1x4x128xf32> to vector<4x128xf32>
    %cst_37 = arith.constant dense<0.000000e+00> : vector<256x128xf32>
    %47 = tpu.matmul %44, %46, %cst_37 {dimension_numbers = #tpu.dot_dimension_numbers<[1], [0], [0], [1], [0, 0, 1, 1], [], []>} : vector<256x4xf32>, vector<4x128xf32>, vector<256x128xf32> -> vector<256x128xf32>
    %c0_38 = arith.constant 0 : index
    %c0_39 = arith.constant 0 : index
    %48 = vector.load %arg8[%c0_38, %c0_39] : memref<256x128xf32, #tpu.memory_space<vmem>>, vector<256x128xf32>
    %49 = arith.addf %48, %47 : vector<256x128xf32>
    %c0_40 = arith.constant 0 : index
    %c0_41 = arith.constant 0 : index
    %50 = vector.load %arg8[%c0_40, %c0_41] : memref<256x128xf32, #tpu.memory_space<vmem>>, vector<256x128xf32>
    tpu.vector_store %arg8[%c0_40, %c0_41], %49 {strides = array<i32>} : memref<256x128xf32, #tpu.memory_space<vmem>>, vector<256x128xf32>,
    %51 = vector.extract_strided_slice %4 {offsets = [2, 0, 0], sizes = [16, 16, 4], strides = [1, 1, 1]} : vector<18x18x4xf32> to vector<16x16x4xf32>
    %52 = vector.shape_cast %51 : vector<16x16x4xf32> to vector<256x4xf32>
    %c6 = arith.constant 6 : index
    %c0_42 = arith.constant 0 : index
    %c0_43 = arith.constant 0 : index
    %53 = vector.load %arg4[%c6, %c0_42, %c0_43] : memref<9x4x128xf32, #tpu.memory_space<vmem>>, vector<1x4x128xf32>
    %54 = vector.shape_cast %53 : vector<1x4x128xf32> to vector<4x128xf32>
    %cst_44 = arith.constant dense<0.000000e+00> : vector<256x128xf32>
    %55 = tpu.matmul %52, %54, %cst_44 {dimension_numbers = #tpu.dot_dimension_numbers<[1], [0], [0], [1], [0, 0, 1, 1], [], []>} : vector<256x4xf32>, vector<4x128xf32>, vector<256x128xf32> -> vector<256x128xf32>
    %c0_45 = arith.constant 0 : index
    %c0_46 = arith.constant 0 : index
    %56 = vector.load %arg8[%c0_45, %c0_46] : memref<256x128xf32, #tpu.memory_space<vmem>>, vector<256x128xf32>
    %57 = arith.addf %56, %55 : vector<256x128xf32>
    %c0_47 = arith.constant 0 : index
    %c0_48 = arith.constant 0 : index
    %58 = vector.load %arg8[%c0_47, %c0_48] : memref<256x128xf32, #tpu.memory_space<vmem>>, vector<256x128xf32>
    tpu.vector_store %arg8[%c0_47, %c0_48], %57 {strides = array<i32>} : memref<256x128xf32, #tpu.memory_space<vmem>>, vector<256x128xf32>,
    %59 = vector.extract_strided_slice %4 {offsets = [2, 1, 0], sizes = [16, 16, 4], strides = [1, 1, 1]} : vector<18x18x4xf32> to vector<16x16x4xf32>
    %60 = vector.shape_cast %59 : vector<16x16x4xf32> to vector<256x4xf32>
    %c7 = arith.constant 7 : index
    %c0_49 = arith.constant 0 : index
    %c0_50 = arith.constant 0 : index
    %61 = vector.load %arg4[%c7, %c0_49, %c0_50] : memref<9x4x128xf32, #tpu.memory_space<vmem>>, vector<1x4x128xf32>
    %62 = vector.shape_cast %61 : vector<1x4x128xf32> to vector<4x128xf32>
    %cst_51 = arith.constant dense<0.000000e+00> : vector<256x128xf32>
    %63 = tpu.matmul %60, %62, %cst_51 {dimension_numbers = #tpu.dot_dimension_numbers<[1], [0], [0], [1], [0, 0, 1, 1], [], []>} : vector<256x4xf32>, vector<4x128xf32>, vector<256x128xf32> -> vector<256x128xf32>
    %c0_52 = arith.constant 0 : index
    %c0_53 = arith.constant 0 : index
    %64 = vector.load %arg8[%c0_52, %c0_53] : memref<256x128xf32, #tpu.memory_space<vmem>>, vector<256x128xf32>
    %65 = arith.addf %64, %63 : vector<256x128xf32>
    %c0_54 = arith.constant 0 : index
    %c0_55 = arith.constant 0 : index
    %66 = vector.load %arg8[%c0_54, %c0_55] : memref<256x128xf32, #tpu.memory_space<vmem>>, vector<256x128xf32>
    tpu.vector_store %arg8[%c0_54, %c0_55], %65 {strides = array<i32>} : memref<256x128xf32, #tpu.memory_space<vmem>>, vector<256x128xf32>,
    %67 = vector.extract_strided_slice %4 {offsets = [2, 2, 0], sizes = [16, 16, 4], strides = [1, 1, 1]} : vector<18x18x4xf32> to vector<16x16x4xf32>
    %68 = vector.shape_cast %67 : vector<16x16x4xf32> to vector<256x4xf32>
    %c8 = arith.constant 8 : index
    %c0_56 = arith.constant 0 : index
    %c0_57 = arith.constant 0 : index
    %69 = vector.load %arg4[%c8, %c0_56, %c0_57] : memref<9x4x128xf32, #tpu.memory_space<vmem>>, vector<1x4x128xf32>
    %70 = vector.shape_cast %69 : vector<1x4x128xf32> to vector<4x128xf32>
    %cst_58 = arith.constant dense<0.000000e+00> : vector<256x128xf32>
    %71 = tpu.matmul %68, %70, %cst_58 {dimension_numbers = #tpu.dot_dimension_numbers<[1], [0], [0], [1], [0, 0, 1, 1], [], []>} : vector<256x4xf32>, vector<4x128xf32>, vector<256x128xf32> -> vector<256x128xf32>
    %c0_59 = arith.constant 0 : index
    %c0_60 = arith.constant 0 : index
    %72 = vector.load %arg8[%c0_59, %c0_60] : memref<256x128xf32, #tpu.memory_space<vmem>>, vector<256x128xf32>
    %73 = arith.addf %72, %71 : vector<256x128xf32>
    %c0_61 = arith.constant 0 : index
    %c0_62 = arith.constant 0 : index
    %74 = vector.load %arg8[%c0_61, %c0_62] : memref<256x128xf32, #tpu.memory_space<vmem>>, vector<256x128xf32>
    tpu.vector_store %arg8[%c0_61, %c0_62], %73 {strides = array<i32>} : memref<256x128xf32, #tpu.memory_space<vmem>>, vector<256x128xf32>,
    %c0_63 = arith.constant 0 : index
    %c0_64 = arith.constant 0 : index
    %75 = vector.load %arg8[%c0_63, %c0_64] : memref<256x128xf32, #tpu.memory_space<vmem>>, vector<256x128xf32>
    %c0_65 = arith.constant 0 : index
    %c0_66 = arith.constant 0 : index
    %76 = vector.load %arg5[%c0_65, %c0_66] : memref<1x128xf32, #tpu.memory_space<vmem>>, vector<1x128xf32>
    %77 = vector.broadcast %76 : vector<1x128xf32> to vector<256x128xf32>
    %78 = arith.mulf %75, %77 : vector<256x128xf32>
    %c0_67 = arith.constant 0 : index
    %c0_68 = arith.constant 0 : index
    %79 = vector.load %arg6[%c0_67, %c0_68] : memref<1x128xf32, #tpu.memory_space<vmem>>, vector<1x128xf32>
    %80 = vector.broadcast %79 : vector<1x128xf32> to vector<256x128xf32>
    %81 = arith.addf %78, %80 : vector<256x128xf32>
    %cst_69 = arith.constant 0.000000e+00 : f32
    %82 = vector.broadcast %cst_69 : f32 to vector<256x128xf32>
    %83 = arith.maximumf %81, %82 : vector<256x128xf32>
    %84 = vector.shape_cast %83 : vector<256x128xf32> to vector<16x16x128xf32>
    %c0_70 = arith.constant 0 : index
    %c0_71 = arith.constant 0 : index
    %c0_72 = arith.constant 0 : index
    %c0_73 = arith.constant 0 : index
    %85 = vector.load %arg7[%c0_70, %c0_71, %c0_72, %c0_73] : memref<1x16x16x128xf32, #tpu.memory_space<vmem>>, vector<1x16x16x128xf32>
    %86 = vector.shape_cast %85 : vector<1x16x16x128xf32> to vector<16x16x128xf32>
    %87 = vector.shape_cast %84 : vector<16x16x128xf32> to vector<1x16x16x128xf32>
    tpu.vector_store %arg7[%c0_70, %c0_71, %c0_72, %c0_73], %87 {strides = array<i32>} : memref<1x16x16x128xf32, #tpu.memory_space<vmem>>, vector<1x16x16x128xf32>,
    return
  }
  func.func @transform_0(%arg0: i32, %arg1: i32, %arg2: i32) -> (i32, i32, i32, i32) {
    %c0_i32 = arith.constant 0 : i32
    %c0_i32_0 = arith.constant 0 : i32
    %c0_i32_1 = arith.constant 0 : i32
    %c0_i32_2 = arith.constant 0 : i32
    return %arg0, %c0_i32, %c0_i32_0, %c0_i32_1 : i32, i32, i32, i32
  }
  func.func @transform_1(%arg0: i32, %arg1: i32, %arg2: i32) -> (i32, i32, i32) {
    %c0_i32 = arith.constant 0 : i32
    %c0_i32_0 = arith.constant 0 : i32
    %c0_i32_1 = arith.constant 0 : i32
    return %c0_i32, %c0_i32_0, %arg2 : i32, i32, i32
  }
  func.func @transform_2(%arg0: i32, %arg1: i32, %arg2: i32) -> (i32, i32) {
    %c0_i32 = arith.constant 0 : i32
    %c0_i32_0 = arith.constant 0 : i32
    return %c0_i32, %arg2 : i32, i32
  }
  func.func @transform_3(%arg0: i32, %arg1: i32, %arg2: i32) -> (i32, i32) {
    %c0_i32 = arith.constant 0 : i32
    %c0_i32_0 = arith.constant 0 : i32
    return %c0_i32, %arg2 : i32, i32
  }
  func.func @transform_4(%arg0: i32, %arg1: i32, %arg2: i32) -> (i32, i32, i32, i32) {
    %c0_i32 = arith.constant 0 : i32
    %c0_i32_0 = arith.constant 0 : i32
    return %arg0, %arg1, %c0_i32, %arg2 : i32, i32, i32, i32
  }
}

</mosaic_0001>

<bundles_post_ra>
// kernel: tpu_custom_call.1
= control target key start
LH: loop header
LB: loop body
LE: loop exit
PB: predicated region body
PF: predicated region fallthrough
CT: control target
= control target key end

     0   :  { %9 = vsyncpa [#allocation4], 0  ;;  %s6818_s0 = inlined_call_operand.vmem [shape: f32[2,18,18,4], index: 0, kind: input, shape index: {}]   ;;  %s6819_s1 = inlined_call_operand.vmem [shape: f32[9,4,128], index: 1, kind: input, shape index: {}]   ;;  %s6820_s2 = inlined_call_operand.vmem [shape: f32[1,128], index: 2, kind: input, shape index: {}]   ;;  %s6821_s3 = inlined_call_operand.vmem [shape: f32[1,128], index: 3, kind: input, shape index: {}]   ;;  %s6822_s4 = inlined_call_operand.hbm [shape: f32[2,16,16,128], index: 4, kind: output, shape index: {}]  }
   0x1   :  { %11 = vsyncpa [#allocation4 + $0x1], 0  ;;  %s5449_s15 = smov 0   ;;  %s5451_s16 = smov 0  }
   0x2   :  { %s5453_s17 = smov 0   ;;  %s5455_s18 = smov 0  }
   0x3   :  { %s5457_s19 = smov 0   ;;  %s5459_s20 = smov 0  }
   0x4 LB: > { %s3955_s21 = sadd.s32 4294967295, %s5419_s20   ;;  %s3956_s22 = sadd.s32 4294967294, %s5419_s20   ;;  %s5419_s20 = sphi %s5459_s20, %s17_s20   ;;  %s5415_s19 = sphi %s5457_s19, %s7005_s19   ;;  %s5411_s18 = sphi %s5455_s18, %s7004_s18   ;;  %s5407_s17 = sphi %s5453_s17, %s7003_s17   ;;  %s5403_s16 = sphi %s5451_s16, %s7002_s16   ;;  %s5399_s15 = sphi %s5449_s15, %s7001_s15  }
   0x5   : > { %s36_s23 = sadd.s32 1, %s5415_s19  ;;  %s151_s24 = sadd.s32 1, %s5407_s17 }
   0x6   : > { %p38_p0 = scmp.ge.s32.totalorder %s36_s23, 2  ;;  %p161_p1 = scmp.ne.s32.totalorder %s5407_s17, %s5403_s16 }
   0x7   : > { %p162_p2 = scmp.eq.s32.totalorder %s3955_s21, 1  ;;  %p167_p3 = scmp.ne.s32.totalorder %s5403_s16, %s5399_s15 }
   0x8   : > { %s7007_s23 = smov (%p38_p0, %s36_s23), 0  ;;  %p168_p5 = scmp.eq.s32.totalorder %s3956_s22, 1 }
   0x9   : > { %p5489_p4 = por %p162_p2, %p161_p1  ;;  %s144_s26 = ssub.s32 %s5415_s19, %s7007_s23 }
   0xa   : > { %p3962_p6 = scmp.ge.s32.totalorder %s5419_s20, 1  ;;  %p149_p7 = scmp.eq.s32.totalorder %s144_s26, 0 }
   0xb   : > { %p5496_p8 = por %p168_p5, %p167_p3  ;;  %p213_p9 = scmp.lt.s32.totalorder %s5419_s20, 3 }
   0xc   : > { %s5502_s28 = scalar_select %p149_p7, %s5407_s17, %s151_s24  }
   0xd   : > { %p214_p10 = pnand %p3962_p6, %p213_p9 }
   0xf   : > { %217 = sbr.rel (%p214_p10) target bundleno = 555 (0x22b), region = 36 }
  0x16   : > { %v322_v0 = vld [vmem:[%s6819_s1] sm:$0xf]  ;;  %vm420_vm0 = vcmask 1043456   ;;  %p249_p11 = scmp.lt.s32.totalorder %s5411_s18, 1  ;;  %v5512_v1 = vld [vmem:[%s6819_s1 + $0x10] sm:$0xf] }
  0x17   : > { %4575 = vmatprep.subr.msk.mxu1 %vm420_vm0, %v322_v0  ;;  %6899 = vst [vmem:[#allocation6_spill] sm:$0xff] %v5512_v1  ;;  %v3998_v2 = vld [vmem:[%s6819_s1 + $0x4] sm:$0xf]  ;;  %v4134_v3 = vld [vmem:[%s6819_s1 + $0x14] sm:$0xf]  ;;  %4775 = vmatprep.subr.msk.mxu0 %vm420_vm0, %v5512_v1  ;;  %vm323_vm1 = vcmask 31744  }
  0x18   : > { %4576 = vmatpush3.msk.msra.mxu1 %vm420_vm0, %v322_v0  ;;  %s250_s11 = scalar_select %p249_p11, %s5411_s18, 1  ;;  %4776 = vmatpush3.msk.msra.mxu0 %vm420_vm0, %v5512_v1  ;;  %vm697_vm2 = vcmask 1046528   ;;  %v5555_v11 = vld [vmem:[%s6819_s1 + $0x8] sm:$0xf]  ;;  %vm1168_vm3 = vcmask 1045504  }
  0x19   : > { %4625 = vmatprep.subr.msk.mxu1 %vm420_vm0, %v3998_v2  ;;  %4825 = vmatprep.subr.msk.mxu0 %vm420_vm0, %v4134_v3  ;;  %v5615_v32 = vld [vmem:[%s6819_s1 + $0x18] sm:$0xf]  ;;  %s246_s10 = sand.u32 1, %s5403_s16   ;;  %s4277_s24 = sshll.u32 %s5411_s18, 12 }
  0x1a   : > { %s5283_s12 = smul.u32 432, %s250_s11  ;;  %s6764_s5 = scalar_lea.hbm %s6822_s4, %s4277_s24 }
  0x1b   : > { %s6772_s18 = scalar_lea.sflag [#allocation4], %s246_s10  ;;  %s5421_s7 = smov [#allocation3]  }
  0x1c   : > { %s5531_s21 = scalar_lea.vmem %s6818_s0, %s5283_s12  ;;  %s5345_s8 = sshll.u32 %s5421_s7, 4  ;;  %s5346_s8 = int_to_ptr.vmem [resolvable:$false] %s5345_s8 }
  0x1d   : > { %v5534_v4 = vld [vmem:[%s5531_s21] sm:$0xff]  ;;  %v5537_v5 = vld [vmem:[%s5531_s21 + $0x8] sm:$0xff]  ;;  %v5540_v6 = vld [vmem:[%s5531_s21 + $0x18] sm:$0xff]  ;;  %s5347_s9 = scalar_lea.vmem %s5346_s8, 8192 }
  0x1e   : > { %6900 = vst [vmem:[#allocation7_spill] sm:$0xff] %v5540_v6  ;;  %4577 = vmatprep.mubr.msk.f32.mxu1 %vm323_vm1, %v5534_v4  ;;  %v1169_v7 = vrot.slane %v5534_v4, 2  ;;  %v1170_v8 = vrot.slane %v5537_v5, 2  ;;  %v5547_v9 = vld [vmem:[%s5531_s21 + $0x20] sm:$0xff]  ;;  %v5550_v10 = vld [vmem:[%s5531_s21 + $0x30] sm:$0xff]  ;;  %v703_v12 = vrot.slane %v5540_v6, 1 }
  0x1f   : > { %6901 = vst [vmem:[#allocation8_spill] sm:$0xff] %v5547_v9  ;;  %4578 = vmatmul.mubr.msk.f32.vlgmr.msra.gmra.mrb[0].mxu1 %vm323_vm1, %v5537_v5  ;;  %v704_v13 = vrot.slane %v5547_v9, 1  ;;  %v5562_v14 = vld [vmem:[%s5531_s21 + $0x28] sm:$0x3]  ;;  %v5565_v15 = vld [vmem:[%s5531_s21 + $0x38] sm:$0xff]  ;;  %v708_v16 = vrot.slane %v5550_v10, 1 }
  0x20   : > { %6902 = vst [vmem:[#allocation9_spill] sm:$0xff] %v5565_v15  ;;  %4580 = vmatprep.mubr.msk.f32.mxu1 %vm323_vm1, %v5540_v6  ;;  %4626 = vmatpush3.msk.msra.mxu1 %vm420_vm0, %v3998_v2  ;;  %v706_v17 = vrot.slane %v5562_v14, 1  ;;  %v709_v18 = vrot.slane %v5565_v15, 1  ;;  %v5574_v19 = vld [vmem:[%s5531_s21 + $0x40] sm:$0x3]  ;;  %v5577_v20 = vld [vmem:[%s5531_s21 + $0x48] sm:$0xff]  ;;  %v5595_v26 = vsel %vm1168_vm3, %v1169_v7, %v1170_v8 }
  0x21   : > { %v5580_v21 = vsel %vm697_vm2, %v703_v12, %v704_v13  ;;  %v711_v22 = vrot.slane %v5574_v19, 1  ;;  %v5584_v23 = vld [vmem:[%s5531_s21 + $0x50] sm:$0xff]  ;;  %v713_v24 = vrot.slane %v5577_v20, 1  ;;  %v5588_v25 = vld [vmem:[%s5531_s21 + $0x58] sm:$0x3]  ;;  %4675 = vmatprep.subr.msk.mxu1 %vm420_vm0, %v5555_v11  ;;  %v5607_v30 = vld [vmem:[%s5531_s21 + $0x60] sm:$0xff] }
  0x22   : > { %4777 = vmatprep.mubr.msk.f32.mxu0 %vm323_vm1, %v5580_v21  ;;  %v5600_v27 = vsel %vm697_vm2, %v704_v13, %v706_v17  ;;  %v5603_v28 = vsel %vm697_vm2, %v708_v16, %v709_v18  ;;  %v714_v29 = vrot.slane %v5584_v23, 1  ;;  %v5610_v31 = vld [vmem:[%s5531_s21 + $0x68] sm:$0xff]  ;;  %v716_v34 = vrot.slane %v5588_v25, 1  ;;  %v5636_v38 = vld [vmem:[%s5531_s21 + $0x70] sm:$0x3]  ;;  %v5641_v39 = vld [vmem:[%s5531_s21 + $0x78] sm:$0xff] }
  0x23   : > { %6903 = vst [vmem:[#allocation10_spill] sm:$0xff] %v5610_v31  ;;  %4778 = vmatmul.mubr.msk.f32.vlgmr.msra.gmra.mrb[0].mxu0 %vm323_vm1, %v5600_v27  ;;  %4581 = vmatmul.mubr.msk.f32.gmra.mrb[2].mxu1 %vm323_vm1, %v5547_v9  ;;  %v5625_v33 = vsel %vm697_vm2, %v709_v18, %v711_v22  ;;  %v718_v36 = vrot.slane %v5607_v30, 1  ;;  %v719_v37 = vrot.slane %v5610_v31, 1  ;;  %v5644_v40 = vld [vmem:[%s5531_s21 + $0x80] sm:$0xff]  ;;  %v721_v42 = vrot.slane %v5636_v38, 1  ;;  %v5667_v47 = vld [vmem:[%s5531_s21 + $0x90] sm:$0xff] }
  0x24   : > { %4826 = vmatpush3.msk.msra.mxu0 %vm420_vm0, %v4134_v3  ;;  %4780 = vmatprep.mubr.msk.f32.mxu0 %vm323_vm1, %v5603_v28  ;;  %v5631_v35 = vsel %vm697_vm2, %v713_v24, %v714_v29  ;;  %6905 = vst [vmem:[#allocation12_spill] sm:$0xff] %v5644_v40  ;;  %v5655_v41 = vsel %vm697_vm2, %v714_v29, %v716_v34  ;;  %v723_v44 = vrot.slane %v5641_v39, 1  ;;  %v724_v45 = vrot.slane %v5644_v40, 1  ;;  %v5664_v46 = vld [vmem:[%s5531_s21 + $0x88] sm:$0x3]  ;;  %v5670_v48 = vld [vmem:[%s5531_s21 + $0x98] sm:$0xff] }
  0x25   : > { %4583 = vmatprep.mubr.msk.f32.mxu1 %vm323_vm1, %v5550_v10  ;;  %6904 = vst [vmem:[#allocation11_spill] sm:$0xff] %v5631_v35  ;;  %4875 = vmatprep.subr.msk.mxu0 %vm420_vm0, %v5615_v32  ;;  %6906 = vst [vmem:[#allocation13_spill] sm:$0xff] %v5655_v41  ;;  %v5659_v43 = vsel %vm697_vm2, %v718_v36, %v719_v37  ;;  %v5681_v49 = vsel %vm697_vm2, %v719_v37, %v721_v42  ;;  %v726_v50 = vrot.slane %v5664_v46, 1  ;;  %v5690_v54 = vld [vmem:[%s5531_s21 + $0xa0] sm:$0x3]  ;;  %v5693_v55 = vld [vmem:[%s5531_s21 + $0xa8] sm:$0xff] }
  0x26   : > { %6907 = vst [vmem:[#allocation14_spill] sm:$0xff] %v5659_v43  ;;  %6908 = vst [vmem:[#allocation15_spill] sm:$0xff] %v5681_v49  ;;  %v5685_v51 = vsel %vm697_vm2, %v723_v44, %v724_v45  ;;  %v728_v52 = vrot.slane %v5667_v47, 1  ;;  %v729_v53 = vrot.slane %v5670_v48, 1  ;;  %v5696_v56 = vld [vmem:[%s5531_s21 + $0xb0] sm:$0xff]  ;;  %v731_v58 = vrot.slane %v5690_v54, 1 }
  0x27   : > { %4781 = vmatmul.mubr.msk.f32.gmra.mrb[2].mxu0 %vm323_vm1, %v5625_v33  ;;  %4584 = vmatmul.mubr.msk.f32.gmra.mrb[4].mxu1 %vm323_vm1, %v5565_v15  ;;  %6909 = vst [vmem:[#allocation16_spill] sm:$0xff] %v5685_v51  ;;  %v5707_v57 = vsel %vm697_vm2, %v724_v45, %v726_v50  ;;  %v733_v60 = vrot.slane %v5693_v55, 1  ;;  %v734_v61 = vrot.slane %v5696_v56, 1  ;;  %v5716_v62 = vld [vmem:[%s5531_s21 + $0xb8] sm:$0x3]  ;;  %v5719_v63 = vld [vmem:[%s5531_s21 + $0xc0] sm:$0xff] }
  0x28   : > { %4783 = vmatprep.mubr.msk.f32.mxu0 %vm323_vm1, %v5631_v35  ;;  %4586 = vmatprep.mubr.msk.f32.mxu1 %vm323_vm1, %v5577_v20  ;;  %v5711_v59 = vsel %vm697_vm2, %v728_v52, %v729_v53  ;;  %v5722_v0 = vld [vmem:[%s5531_s21 + $0xc8] sm:$0xff]  ;;  %v5733_v2 = vsel %vm697_vm2, %v729_v53, %v731_v58  ;;  %v736_v3 = vrot.slane %v5716_v62, 1  ;;  %v738_v12 = vrot.slane %v5719_v63, 1  ;;  %v5742_v16 = vld [vmem:[%s5531_s21 + $0xd0] sm:$0x3]  ;;  %v5777_v42 = vld [vmem:[%s5531_s21 + $0xd8] sm:$0xff] }
  0x29   : > { %v5737_v7 = vsel %vm697_vm2, %v733_v60, %v734_v61  ;;  %v739_v13 = vrot.slane %v5722_v0, 1  ;;  %v741_v18 = vrot.slane %v5742_v16, 1  ;;  %v1174_v24 = vrot.slane %v5540_v6, 2  ;;  %v5793_v50 = vld [vmem:[%s5531_s21 + $0xe0] sm:$0xff] }
  0x2a   : > { %v5753_v17 = vsel %vm697_vm2, %v734_v61, %v736_v3  ;;  %v1175_v29 = vrot.slane %v5547_v9, 2  ;;  %v1177_v34 = vrot.slane %v5562_v14, 2  ;;  %v1179_v44 = vrot.slane %v5550_v10, 2  ;;  %v5802_v61 = vld [vmem:[%s5531_s21 + $0xf0] sm:$0xff]  ;;  %v5807_v3 = vld [vmem:[%s6819_s1 + $0x1c] sm:$0xf] }
  0x2b   : > { %4784 = vmatmul.mubr.msk.f32.gmra.mrb[4].mxu0 %vm323_vm1, %v5655_v41  ;;  %4587 = vmatmul.mubr.msk.f32.gmra.mrb[6].mxu1 %vm323_vm1, %v5584_v23  ;;  %v5757_v22 = vsel %vm697_vm2, %v738_v12, %v739_v13  ;;  %v5771_v36 = vsel %vm697_vm2, %v739_v13, %v741_v18  ;;  %v1180_v45 = vrot.slane %v5565_v15, 2  ;;  %v1182_v52 = vrot.slane %v5574_v19, 2  ;;  %v5821_v12 = vld [vmem:[%s5531_s21 + $0xf8] sm:$0xff]  ;;  %v5864_v6 = vld [vmem:[%s5531_s21 + $0x120] sm:$0xff] }
  0x2c   : > { %4786 = vmatprep.mubr.msk.f32.mxu0 %vm323_vm1, %v5659_v43  ;;  %4589 = vmatprep.mubr.msk.f32.mxu1 %vm323_vm1, %v5607_v30  ;;  %v5774_v37 = vsel %vm1168_vm3, %v1174_v24, %v1175_v29  ;;  %v5790_v14 = vsel %vm1168_vm3, %v1175_v29, %v1177_v34  ;;  %v1184_v58 = vrot.slane %v5577_v20, 2  ;;  %v1185_v60 = vrot.slane %v5584_v23, 2  ;;  %v5830_v24 = vld [vmem:[%s5531_s21 + $0x108] sm:$0xff]  ;;  %v5835_v34 = vld [vmem:[%s5531_s21 + $0x10] sm:$0x3] }
  0x2d   : > { %6910 = vst [vmem:[#allocation17_spill] sm:$0xff] %v5774_v37  ;;  %6911 = vst [vmem:[#allocation18_spill] sm:$0xff] %v5790_v14  ;;  %v5797_v53 = vsel %vm1168_vm3, %v1179_v44, %v1180_v45  ;;  %v5818_v19 = vsel %vm1168_vm3, %v1180_v45, %v1182_v52  ;;  %v1187_v13 = vrot.slane %v5588_v25, 2  ;;  %v1190_v29 = vrot.slane %v5610_v31, 2  ;;  %v5852_v45 = vld [vmem:[%s5531_s21 + $0x110] sm:$0xff] }
  0x2e   : > { %6912 = vst [vmem:[#allocation19_spill] sm:$0xff] %v5797_v53  ;;  %6913 = vst [vmem:[#allocation20_spill] sm:$0xff] %v5818_v19  ;;  %v5827_v18 = vsel %vm1168_vm3, %v1184_v58, %v1185_v60  ;;  %v1172_v25 = vrot.slane %v5835_v34, 2  ;;  %v1192_v52 = vrot.slane %v5636_v38, 2  ;;  %v5880_v38 = vld [vmem:[%s5531_s21 + $0x128] sm:$0xff]  ;;  %v1215_v1 = vrot.slane %v5793_v50, 2 }
  0x2f   : > { %4787 = vmatmul.mubr.msk.f32.gmra.mrb[6].mxu0 %vm323_vm1, %v5681_v49  ;;  %4590 = vmatmul.mubr.msk.f32.gmra.mrb[8].mxu1 %vm323_vm1, %v5610_v31  ;;  %6914 = vst [vmem:[#allocation21_spill] sm:$0xff] %v5827_v18  ;;  %v5849_v44 = vsel %vm1168_vm3, %v1185_v60, %v1187_v13  ;;  %v1195_v60 = vrot.slane %v5644_v40, 2  ;;  %v1197_v13 = vrot.slane %v5664_v46, 2 }
  0x30   : > { %4789 = vmatprep.mubr.msk.f32.mxu0 %vm323_vm1, %v5685_v51  ;;  %4592 = vmatprep.mubr.msk.f32.mxu1 %vm323_vm1, %v5641_v39  ;;  %6915 = vst [vmem:[#allocation22_spill] sm:$0xff] %v5849_v44  ;;  %v5858_v58 = vsel %vm1168_vm3, %v1170_v8, %v1172_v25  ;;  %v5877_v8 = vsel %vm1168_vm3, %v1190_v29, %v1192_v52  ;;  %v5887_v25 = vld [vmem:[%s5531_s21 + $0x138] sm:$0xff] }
  0x31   : > { %6917 = vst [vmem:[#allocation24_spill] sm:$0xff] %v5877_v8  ;;  %6919 = vst [vmem:[#allocation26_spill] sm:$0xff] %v5887_v25  ;;  %v5900_v46 = vsel %vm1168_vm3, %v1195_v60, %v1197_v13  ;;  %v1207_v13 = vrot.slane %v5716_v62, 2  ;;  %v1212_v62 = vrot.slane %v5742_v16, 2 }
  0x32   : > { %6920 = vst [vmem:[#allocation27_spill] sm:$0xff] %v5900_v46 }
  0x33   : > { %4790 = vmatmul.mubr.msk.f32.gmra.mrb[8].mxu0 %vm323_vm1, %v5707_v57  ;;  %4593 = vmatmul.mubr.msk.f32.gmra.mrb[10].mxu1 %vm323_vm1, %v5644_v40 }
  0x34   : > { %4792 = vmatprep.mubr.msk.f32.mxu0 %vm323_vm1, %v5711_v59  ;;  %4595 = vmatprep.mubr.msk.f32.mxu1 %vm323_vm1, %v5667_v47 }
  0x37   : > { %4793 = vmatmul.mubr.msk.f32.gmra.mrb[10].mxu0 %vm323_vm1, %v5733_v2  ;;  %4596 = vmatmul.mubr.msk.f32.gmra.mrb[12].mxu1 %vm323_vm1, %v5670_v48 }
  0x38   : > { %4795 = vmatprep.mubr.msk.f32.mxu0 %vm323_vm1, %v5737_v7  ;;  %4598 = vmatprep.mubr.msk.f32.mxu1 %vm323_vm1, %v5693_v55 }
  0x3b   : > { %4796 = vmatmul.mubr.msk.f32.gmra.mrb[12].mxu0 %vm323_vm1, %v5753_v17  ;;  %4599 = vmatmul.mubr.msk.f32.gmra.mrb[14].mxu1 %vm323_vm1, %v5696_v56 }
  0x3c   : > { %4798 = vmatprep.mubr.msk.f32.mxu0 %vm323_vm1, %v5757_v22  ;;  %4601 = vmatprep.mubr.msk.f32.mxu1 %vm323_vm1, %v5719_v63 }
  0x3f   : > { %4799 = vmatmul.mubr.msk.f32.gmra.mrb[14].mxu0 %vm323_vm1, %v5771_v36  ;;  %4602 = vmatmul.mubr.msk.f32.gmra.mrb[16].mxu1 %vm323_vm1, %v5722_v0 }
  0x40   : > { %4827 = vmatprep.mubr.msk.f32.mxu0 %vm323_vm1, %v5774_v37  ;;  %4604 = vmatprep.mubr.msk.f32.mxu1 %vm323_vm1, %v5777_v42  ;;  %v5962_v37 = vld [vmem:[%s5531_s21 + $0xe8] sm:$0x3] }
  0x43   : > { %4828 = vmatmul.mubr.msk.f32.vlgmr.msra.gmra.mrb[0].mxu0 %vm323_vm1, %v5790_v14  ;;  %4605 = vmatmul.mubr.msk.f32.gmra.mrb[18].mxu1 %vm323_vm1, %v5793_v50  ;;  %v1210_v14 = vrot.slane %v5722_v0, 2 }
  0x44   : > { %4876 = vmatpush3.msk.msra.mxu0 %vm420_vm0, %v5615_v32  ;;  %4830 = vmatprep.mubr.msk.f32.mxu0 %vm323_vm1, %v5797_v53  ;;  %v1189_v32 = vrot.slane %v5607_v30, 2 }
  0x45   : > { %4607 = vmatprep.mubr.msk.f32.mxu1 %vm323_vm1, %v5802_v61  ;;  %4925 = vmatprep.subr.msk.mxu0 %vm420_vm0, %v5807_v3  ;;  %v5972_v16 = vsel %vm1168_vm3, %v1210_v14, %v1212_v62  ;;  %v1224_v62 = vrot.slane %v5830_v24, 2 }
  0x46   : > { %v5861_v9 = vsel %vm1168_vm3, %v1189_v32, %v1190_v29  ;;  %v1202_v29 = vrot.slane %v5690_v54, 2  ;;  %6931 = vst [vmem:[#allocation38_spill] sm:$0xff] %v5972_v16 }
  0x47   : > { %4831 = vmatmul.mubr.msk.f32.gmra.mrb[2].mxu0 %vm323_vm1, %v5818_v19  ;;  %4608 = vmatmul.mubr.msk.f32.gmra.mrb[20].mxu1 %vm323_vm1, %v5821_v12  ;;  %6916 = vst [vmem:[#allocation23_spill] sm:$0xff] %v5861_v9  ;;  %v1204_v19 = vrot.slane %v5693_v55, 2 }
  0x48   : > { %4833 = vmatprep.mubr.msk.f32.mxu0 %vm323_vm1, %v5827_v18  ;;  %4610 = vmatprep.mubr.msk.f32.mxu1 %vm323_vm1, %v5830_v24  ;;  %v1194_v18 = vrot.slane %v5641_v39, 2 }
  0x4a   : > { %v5884_v32 = vsel %vm1168_vm3, %v1194_v18, %v1195_v60  ;;  %v5903_v18 = vld [vmem:[%s5531_s21 + $0x140] sm:$0xff]  ;;  %v698_v60 = vrot.slane %v5534_v4, 1  ;;  %v5935_v4 = vld [vmem:[%s5531_s21 + $0x168] sm:$0xff] }
  0x4b   : > { %4834 = vmatmul.mubr.msk.f32.gmra.mrb[4].mxu0 %vm323_vm1, %v5849_v44  ;;  %4611 = vmatmul.mubr.msk.f32.gmra.mrb[22].mxu1 %vm323_vm1, %v5852_v45  ;;  %6918 = vst [vmem:[#allocation25_spill] sm:$0xff] %v5884_v32  ;;  %v1199_v44 = vrot.slane %v5667_v47, 2  ;;  %6921 = vst [vmem:[#allocation28_spill] sm:$0xff] %v5903_v18 }
  0x4c   : > { %4836 = vmatprep.mubr.msk.f32.mxu0 %vm323_vm1, %v5861_v9  ;;  %4613 = vmatprep.mubr.msk.f32.mxu1 %vm323_vm1, %v5864_v6  ;;  %v1200_v9 = vrot.slane %v5670_v48, 2  ;;  %6927 = vst [vmem:[#allocation34_spill] sm:$0xff] %v5935_v4 }
  0x4e   : > { %v5907_v52 = vsel %vm1168_vm3, %v1199_v44, %v1200_v9  ;;  %v5924_v54 = vsel %vm1168_vm3, %v1200_v9, %v1202_v29  ;;  %v5927_v44 = vld [vmem:[%s5531_s21 + $0x158] sm:$0xff]  ;;  %v5951_v9 = vld [vmem:[%s5531_s21 + $0x170] sm:$0xff] }
  0x4f   : > { %4837 = vmatmul.mubr.msk.f32.gmra.mrb[6].mxu0 %vm323_vm1, %v5877_v8  ;;  %4614 = vmatmul.mubr.msk.f32.gmra.mrb[24].mxu1 %vm323_vm1, %v5880_v38  ;;  %6922 = vst [vmem:[#allocation29_spill] sm:$0xff] %v5907_v52  ;;  %v5910_v8 = vld [vmem:[%s5531_s21 + $0x150] sm:$0xff]  ;;  %6924 = vst [vmem:[#allocation31_spill] sm:$0xff] %v5924_v54 }
  0x50   : > { %4839 = vmatprep.mubr.msk.f32.mxu0 %vm323_vm1, %v5884_v32  ;;  %4616 = vmatprep.mubr.msk.f32.mxu1 %vm323_vm1, %v5887_v25  ;;  %6923 = vst [vmem:[#allocation30_spill] sm:$0xff] %v5910_v8  ;;  %v1205_v32 = vrot.slane %v5696_v56, 2  ;;  %6925 = vst [vmem:[#allocation32_spill] sm:$0xff] %v5927_v44 }
  0x51   : > { %6929 = vst [vmem:[#allocation36_spill] sm:$0xff] %v5951_v9 }
  0x52   : > { %v5932_v53 = vsel %vm1168_vm3, %v1204_v19, %v1205_v32  ;;  %v701_v19 = vrot.slane %v5835_v34, 1 }
  0x53   : > { %4840 = vmatmul.mubr.msk.f32.gmra.mrb[8].mxu0 %vm323_vm1, %v5900_v46  ;;  %4617 = vmatmul.mubr.msk.f32.gmra.mrb[26].mxu1 %vm323_vm1, %v5903_v18  ;;  %v699_v46 = vrot.slane %v5537_v5, 1  ;;  %6926 = vst [vmem:[#allocation33_spill] sm:$0xff] %v5932_v53  ;;  %v5948_v5 = vsel %vm1168_vm3, %v1205_v32, %v1207_v13  ;;  %v1217_v32 = vrot.slane %v5962_v37, 2  ;;  %v1220_v13 = vrot.slane %v5821_v12, 2 }
  0x54   : > { %4842 = vmatprep.mubr.msk.f32.mxu0 %vm323_vm1, %v5907_v52  ;;  %4619 = vmatprep.mubr.msk.f32.mxu1 %vm323_vm1, %v5910_v8  ;;  %v1209_v52 = vrot.slane %v5719_v63, 2  ;;  %6928 = vst [vmem:[#allocation35_spill] sm:$0xff] %v5948_v5 }
  0x55   : > { %v702_v34 = vsel %vm697_vm2, %v699_v46, %v701_v19  ;;  %v1225_v19 = vrot.slane %v5852_v45, 2 }
  0x56   : > { %v5956_v29 = vsel %vm1168_vm3, %v1209_v52, %v1210_v14  ;;  %v5990_v14 = vld [vmem:[%s6819_s1 + $0xc] sm:$0xf] }
  0x57   : > { %4843 = vmatmul.mubr.msk.f32.gmra.mrb[10].mxu0 %vm323_vm1, %v5924_v54  ;;  %4620 = vmatmul.mubr.msk.f32.gmra.mrb[28].mxu1 %vm323_vm1, %v5927_v44  ;;  %6930 = vst [vmem:[#allocation37_spill] sm:$0xff] %v5956_v29  ;;  %v700_v54 = vsel %vm697_vm2, %v698_v60, %v699_v46  ;;  %v1219_v60 = vrot.slane %v5802_v61, 2 }
  0x58   : > { %4845 = vmatprep.mubr.msk.f32.mxu0 %vm323_vm1, %v5932_v53  ;;  %4622 = vmatprep.mubr.msk.f32.mxu1 %vm323_vm1, %v5935_v4  ;;  %v1214_v53 = vrot.slane %v5777_v42, 2 }
  0x5a   : > { %v5977_v52 = vsel %vm1168_vm3, %v1214_v53, %v1215_v1  ;;  %v5997_v53 = vsel %vm1168_vm3, %v1215_v1, %v1217_v32  ;;  %v1229_v32 = vrot.slane %v5864_v6, 2 }
  0x5b   : > { %4846 = vmatmul.mubr.msk.f32.gmra.mrb[12].mxu0 %vm323_vm1, %v5948_v5  ;;  %4623 = vmatmul.mubr.msk.f32.gmra.mrb[30].mxu1 %vm323_vm1, %v5951_v9  ;;  %6932 = vst [vmem:[#allocation39_spill] sm:$0xff] %v5977_v52  ;;  %v5982_v5 = vld [vmem:[%s5531_s21 + $0x100] sm:$0x3]  ;;  %6933 = vst [vmem:[#allocation40_spill] sm:$0xff] %v5997_v53 }
  0x5c   : > { %4848 = vmatprep.mubr.msk.f32.mxu0 %vm323_vm1, %v5956_v29  ;;  %4627 = vmatprep.mubr.msk.f32.mxu1 %vm323_vm1, %v700_v54  ;;  %v1222_v46 = vrot.slane %v5982_v5, 2  ;;  %v6003_v54 = vsel %vm1168_vm3, %v1219_v60, %v1220_v13  ;;  %v1230_v60 = vrot.slane %v5880_v38, 2 }
  0x5d   : > { %6934 = vst [vmem:[#allocation41_spill] sm:$0xff] %v6003_v54 }
  0x5e   : > { %v6021_v1 = vsel %vm1168_vm3, %v1220_v13, %v1222_v46 }
  0x5f   : > { %4849 = vmatmul.mubr.msk.f32.gmra.mrb[14].mxu0 %vm323_vm1, %v5972_v16  ;;  %4628 = vmatmul.mubr.msk.f32.vlgmr.msra.gmra.mrb[0].mxu1 %vm323_vm1, %v702_v34  ;;  %v6008_v34 = vld [vmem:[%s5531_s21 + $0x118] sm:$0x3]  ;;  %6935 = vst [vmem:[#allocation42_spill] sm:$0xff] %v6021_v1 }
  0x60   : > { %4851 = vmatprep.mubr.msk.f32.mxu0 %vm323_vm1, %v5977_v52  ;;  %4630 = vmatprep.mubr.msk.f32.mxu1 %vm323_vm1, %v5580_v21  ;;  %v6025_v21 = vsel %vm1168_vm3, %v1224_v62, %v1225_v19  ;;  %v6045_v62 = vsel %vm1168_vm3, %v1229_v32, %v1230_v60 }
  0x61   : > { %4676 = vmatpush3.msk.msra.mxu1 %vm420_vm0, %v5555_v11  ;;  %v1227_v11 = vrot.slane %v6008_v34, 2  ;;  %6936 = vst [vmem:[#allocation43_spill] sm:$0xff] %v6025_v21  ;;  %6938 = vst [vmem:[#allocation45_spill] sm:$0xff] %v6045_v62 }
  0x62   : > { %4725 = vmatprep.subr.msk.mxu1 %vm420_vm0, %v5990_v14 }
  0x63   : > { %4852 = vmatmul.mubr.msk.f32.gmra.mrb[16].mxu0 %vm323_vm1, %v5997_v53  ;;  %4631 = vmatmul.mubr.msk.f32.gmra.mrb[2].mxu1 %vm323_vm1, %v5600_v27  ;;  %v6030_v27 = vld [vmem:[%s5531_s21 + $0x130] sm:$0x3]  ;;  %v6041_v13 = vsel %vm1168_vm3, %v1225_v19, %v1227_v11  ;;  %v6050_v53 = vld [vmem:[%s5531_s21 + $0x148] sm:$0x3] }
  0x64   : > { %4854 = vmatprep.mubr.msk.f32.mxu0 %vm323_vm1, %v6003_v54  ;;  %4633 = vmatprep.mubr.msk.f32.mxu1 %vm323_vm1, %v5603_v28  ;;  %6937 = vst [vmem:[#allocation44_spill] sm:$0xff] %v6041_v13  ;;  %v1232_v46 = vrot.slane %v6030_v27, 2  ;;  %v1235_v54 = vrot.slane %v5903_v18, 2  ;;  %v1237_v11 = vrot.slane %v6050_v53, 2 }
  0x66   : > { %v6061_v19 = vsel %vm1168_vm3, %v1230_v60, %v1232_v46 }
  0x67   : > { %4855 = vmatmul.mubr.msk.f32.gmra.mrb[18].mxu0 %vm323_vm1, %v6021_v1  ;;  %4634 = vmatmul.mubr.msk.f32.gmra.mrb[4].mxu1 %vm323_vm1, %v5625_v33  ;;  %v1234_v1 = vrot.slane %v5887_v25, 2  ;;  %6939 = vst [vmem:[#allocation46_spill] sm:$0xff] %v6061_v19 }
  0x68   : > { %4857 = vmatprep.mubr.msk.f32.mxu0 %vm323_vm1, %v6025_v21  ;;  %4636 = vmatprep.mubr.msk.f32.mxu1 %vm323_vm1, %v5631_v35  ;;  %v1240_v21 = vrot.slane %v5927_v44, 2  ;;  %v6116_v35 = vld [vmem:[%s5531_s21 + $0x190] sm:$0x3] }
  0x69   : > { %v6065_v32 = vsel %vm1168_vm3, %v1234_v1, %v1235_v54  ;;  %v6081_v1 = vsel %vm1168_vm3, %v1235_v54, %v1237_v11  ;;  %6944 = vst [vmem:[#allocation51_spill] sm:$0xff] %v6116_v35 }
  0x6a   : > { %6940 = vst [vmem:[#allocation47_spill] sm:$0xff] %v6065_v32  ;;  %6941 = vst [vmem:[#allocation48_spill] sm:$0xff] %v6081_v1 }
  0x6b   : > { %4858 = vmatmul.mubr.msk.f32.gmra.mrb[20].mxu0 %vm323_vm1, %v6041_v13  ;;  %4637 = vmatmul.mubr.msk.f32.gmra.mrb[6].mxu1 %vm323_vm1, %v5655_v41  ;;  %v1239_v13 = vrot.slane %v5910_v8, 2  ;;  %v6070_v41 = vld [vmem:[%s5531_s21 + $0x160] sm:$0x3] }
  0x6c   : > { %4860 = vmatprep.mubr.msk.f32.mxu0 %vm323_vm1, %v6045_v62  ;;  %4639 = vmatprep.mubr.msk.f32.mxu1 %vm323_vm1, %v5659_v43  ;;  %v1242_v60 = vrot.slane %v6070_v41, 2  ;;  %v1245_v62 = vrot.slane %v5951_v9, 2  ;;  %v6093_v43 = vld [vmem:[%s5531_s21 + $0x180] sm:$0xff] }
  0x6d   : > { %v6085_v46 = vsel %vm1168_vm3, %v1239_v13, %v1240_v21 }
  0x6e   : > { %6942 = vst [vmem:[#allocation49_spill] sm:$0xff] %v6085_v46  ;;  %v6107_v54 = vsel %vm1168_vm3, %v1240_v21, %v1242_v60 }
  0x6f   : > { %4861 = vmatmul.mubr.msk.f32.gmra.mrb[22].mxu0 %vm323_vm1, %v6061_v19  ;;  %4640 = vmatmul.mubr.msk.f32.gmra.mrb[8].mxu1 %vm323_vm1, %v5681_v49  ;;  %v1244_v19 = vrot.slane %v5935_v4, 2  ;;  %v6090_v49 = vld [vmem:[%s5531_s21 + $0x178] sm:$0x3]  ;;  %6943 = vst [vmem:[#allocation50_spill] sm:$0xff] %v6107_v54 }
  0x70   : > { %4863 = vmatprep.mubr.msk.f32.mxu0 %vm323_vm1, %v6065_v32  ;;  %4642 = vmatprep.mubr.msk.f32.mxu1 %vm323_vm1, %v5685_v51  ;;  %v6096_v32 = vld [vmem:[%s5531_s21 + $0x188] sm:$0xff]  ;;  %v1247_v13 = vrot.slane %v6090_v49, 2  ;;  %v2307_v51 = vrot.slane %v6093_v43, 2 }
  0x71   : > { %v6111_v11 = vsel %vm1168_vm3, %v1244_v19, %v1245_v62  ;;  %v2310_v19 = vrot.slane %v6116_v35, 2  ;;  %v748_v35 = vrot.slane %v5802_v61, 1 }
  0x72   : > { %v6127_v21 = vsel %vm1168_vm3, %v1245_v62, %v1247_v13 }
  0x73   : > { %4864 = vmatmul.mubr.msk.f32.gmra.mrb[24].mxu0 %vm323_vm1, %v6081_v1  ;;  %4643 = vmatmul.mubr.msk.f32.gmra.mrb[10].mxu1 %vm323_vm1, %v5707_v57  ;;  %v2308_v1 = vrot.slane %v6096_v32, 2  ;;  %6945 = vst [vmem:[#allocation52_spill] sm:$0xff] %v6127_v21 }
  0x74   : > { %4866 = vmatprep.mubr.msk.f32.mxu0 %vm323_vm1, %v6085_v46  ;;  %4645 = vmatprep.mubr.msk.f32.mxu1 %vm323_vm1, %v5711_v59  ;;  %v743_v46 = vrot.slane %v5777_v42, 1 }
  0x75   : > { %v6131_v60 = vsel %vm1168_vm3, %v2307_v51, %v2308_v1  ;;  %v6144_v62 = vsel %vm1168_vm3, %v2308_v1, %v2310_v19  ;;  %v746_v51 = vrot.slane %v5962_v37, 1  ;;  %v751_v1 = vrot.slane %v5982_v5, 1 }
  0x76   : > { %6946 = vst [vmem:[#allocation53_spill] sm:$0xff] %v6131_v60  ;;  %6947 = vst [vmem:[#allocation54_spill] sm:$0xff] %v6144_v62  ;;  %v754_v19 = vrot.slane %v5852_v45, 1  ;;  %v756_v5 = vrot.slane %v6008_v34, 1  ;;  %v761_v34 = vrot.slane %v6030_v27, 1 }
  0x77   : > { %4867 = vmatmul.mubr.msk.f32.gmra.mrb[26].mxu0 %vm323_vm1, %v6107_v54  ;;  %4646 = vmatmul.mubr.msk.f32.gmra.mrb[12].mxu1 %vm323_vm1, %v5733_v2  ;;  %v744_v54 = vrot.slane %v5793_v50, 1 }
  0x78   : > { %4869 = vmatprep.mubr.msk.f32.mxu0 %vm323_vm1, %v6111_v11  ;;  %4648 = vmatprep.mubr.msk.f32.mxu1 %vm323_vm1, %v5737_v7 }
  0x79   : > { %v6148_v13 = vsel %vm697_vm2, %v743_v46, %v744_v54  ;;  %v6161_v37 = vsel %vm697_vm2, %v744_v54, %v746_v51  ;;  %v753_v46 = vrot.slane %v5830_v24, 1  ;;  %v758_v51 = vrot.slane %v5864_v6, 1 }
  0x7b   : > { %4870 = vmatmul.mubr.msk.f32.gmra.mrb[28].mxu0 %vm323_vm1, %v6127_v21  ;;  %4649 = vmatmul.mubr.msk.f32.gmra.mrb[14].mxu1 %vm323_vm1, %v5753_v17  ;;  %v749_v21 = vrot.slane %v5821_v12, 1  ;;  %v6189_v54 = vsel %vm697_vm2, %v753_v46, %v754_v19  ;;  %v764_v46 = vrot.slane %v5903_v18, 1 }
  0x7c   : > { %4872 = vmatprep.mubr.msk.f32.mxu0 %vm323_vm1, %v6131_v60  ;;  %4651 = vmatprep.mubr.msk.f32.mxu1 %vm323_vm1, %v5757_v22  ;;  %v6172_v60 = vld [vmem:[%s6819_s1 + $0x20] sm:$0xf] }
  0x7f   : > { %4873 = vmatmul.mubr.msk.f32.gmra.mrb[30].mxu0 %vm323_vm1, %v6144_v62  ;;  %4652 = vmatmul.mubr.msk.f32.gmra.mrb[16].mxu1 %vm323_vm1, %v5771_v36  ;;  %v6167_v62 = vsel %vm697_vm2, %v748_v35, %v749_v21  ;;  %v6183_v35 = vsel %vm697_vm2, %v749_v21, %v751_v1  ;;  %v763_v1 = vrot.slane %v5887_v25, 1 }
  0x80   : > { %4877 = vmatprep.mubr.msk.f32.mxu0 %vm323_vm1, %v5550_v10  ;;  %4654 = vmatprep.mubr.msk.f32.mxu1 %vm323_vm1, %v6148_v13 }
  0x83   : > { %4878 = vmatmul.mubr.msk.f32.vlgmr.msra.gmra.mrb[0].mxu0 %vm323_vm1, %v5565_v15  ;;  %4655 = vmatmul.mubr.msk.f32.gmra.mrb[18].mxu1 %vm323_vm1, %v6161_v37  ;;  %v759_v15 = vrot.slane %v5880_v38, 1 }
  0x84   : > { %4926 = vmatpush3.msk.msra.mxu0 %vm420_vm0, %v5807_v3  ;;  %4880 = vmatprep.mubr.msk.f32.mxu0 %vm323_vm1, %v5577_v20  ;;  %v6204_v3 = vsel %vm697_vm2, %v754_v19, %v756_v5  ;;  %v766_v19 = vrot.slane %v6050_v53, 1  ;;  %v6225_v5 = vsel %vm697_vm2, %v763_v1, %v764_v46  ;;  %v771_v53 = vrot.slane %v6070_v41, 1 }
  0x85   : > { %4657 = vmatprep.mubr.msk.f32.mxu1 %vm323_vm1, %v6167_v62  ;;  %4975 = vmatprep.subr.msk.mxu0 %vm420_vm0, %v6172_v60  ;;  %v6208_v21 = vsel %vm697_vm2, %v758_v51, %v759_v15  ;;  %v6221_v27 = vsel %vm697_vm2, %v759_v15, %v761_v34  ;;  %v768_v51 = vrot.slane %v5910_v8, 1  ;;  %v773_v1 = vrot.slane %v5935_v4, 1 }
  0x86   : > { %v6238_v15 = vsel %vm697_vm2, %v764_v46, %v766_v19  ;;  %v776_v46 = vrot.slane %v6090_v49, 1  ;;  %v6949_v49 = vld [vmem:[#allocation6_spill] sm:$0xff] }
  0x87   : > { %4881 = vmatmul.mubr.msk.f32.gmra.mrb[2].mxu0 %vm323_vm1, %v5584_v23  ;;  %4658 = vmatmul.mubr.msk.f32.gmra.mrb[20].mxu1 %vm323_vm1, %v6183_v35 }
  0x88   : > { %4883 = vmatprep.mubr.msk.f32.mxu0 %vm323_vm1, %v5607_v30  ;;  %4660 = vmatprep.mubr.msk.f32.mxu1 %vm323_vm1, %v6189_v54 }
  0x8b   : > { %4884 = vmatmul.mubr.msk.f32.gmra.mrb[4].mxu0 %vm323_vm1, %v5610_v31  ;;  %4661 = vmatmul.mubr.msk.f32.gmra.mrb[22].mxu1 %vm323_vm1, %v6204_v3  ;;  %v769_v31 = vrot.slane %v5927_v44, 1 }
  0x8c   : > { %4886 = vmatprep.mubr.msk.f32.mxu0 %vm323_vm1, %v5641_v39  ;;  %4663 = vmatprep.mubr.msk.f32.mxu1 %vm323_vm1, %v6208_v21 }
  0x8d   : > { %v6242_v34 = vsel %vm697_vm2, %v768_v51, %v769_v31  ;;  %v6255_v41 = vsel %vm697_vm2, %v769_v31, %v771_v53  ;;  %v6952_v51 = vld [vmem:[#allocation20_spill] sm:$0xff]  ;;  %v6954_v53 = vld [vmem:[#allocation22_spill] sm:$0xff] }
  0x8f   : > { %4887 = vmatmul.mubr.msk.f32.gmra.mrb[6].mxu0 %vm323_vm1, %v5644_v40  ;;  %4664 = vmatmul.mubr.msk.f32.gmra.mrb[24].mxu1 %vm323_vm1, %v6221_v27  ;;  %v774_v40 = vrot.slane %v5951_v9, 1 }
  0x90   : > { %4889 = vmatprep.mubr.msk.f32.mxu0 %vm323_vm1, %v5667_v47  ;;  %4666 = vmatprep.mubr.msk.f32.mxu1 %vm323_vm1, %v6225_v5 }
  0x91   : > { %v6259_v19 = vsel %vm697_vm2, %v773_v1, %v774_v40  ;;  %v6270_v31 = vsel %vm697_vm2, %v774_v40, %v776_v46  ;;  %v6948_v40 = vld [vmem:[#allocation17_spill] sm:$0xff]  ;;  %v6955_v1 = vld [vmem:[#allocation23_spill] sm:$0xff]  ;;  %v6956_v46 = vld [vmem:[#allocation24_spill] sm:$0xff] }
  0x93   : > { %4890 = vmatmul.mubr.msk.f32.gmra.mrb[8].mxu0 %vm323_vm1, %v5670_v48  ;;  %4667 = vmatmul.mubr.msk.f32.gmra.mrb[26].mxu1 %vm323_vm1, %v6238_v15 }
  0x94   : > { %4892 = vmatprep.mubr.msk.f32.mxu0 %vm323_vm1, %v5693_v55  ;;  %4669 = vmatprep.mubr.msk.f32.mxu1 %vm323_vm1, %v6242_v34 }
  0x97   : > { %4893 = vmatmul.mubr.msk.f32.gmra.mrb[10].mxu0 %vm323_vm1, %v5696_v56  ;;  %4670 = vmatmul.mubr.msk.f32.gmra.mrb[28].mxu1 %vm323_vm1, %v6255_v41 }
  0x98   : > { %4895 = vmatprep.mubr.msk.f32.mxu0 %vm323_vm1, %v5719_v63  ;;  %4672 = vmatprep.mubr.msk.f32.mxu1 %vm323_vm1, %v6259_v19 }
  0x9b   : > { %4896 = vmatmul.mubr.msk.f32.gmra.mrb[12].mxu0 %vm323_vm1, %v5722_v0  ;;  %4673 = vmatmul.mubr.msk.f32.gmra.mrb[30].mxu1 %vm323_vm1, %v6270_v31 }
  0x9c   : > { %4898 = vmatprep.mubr.msk.f32.mxu0 %vm323_vm1, %v5777_v42  ;;  %4677 = vmatprep.mubr.msk.f32.mxu1 %vm323_vm1, %v5595_v26  ;;  %v6950_v26 = vld [vmem:[#allocation18_spill] sm:$0xff] }
  0x9f   : > { %4899 = vmatmul.mubr.msk.f32.gmra.mrb[14].mxu0 %vm323_vm1, %v5793_v50  ;;  %4678 = vmatmul.mubr.msk.f32.vlgmr.msra.gmra.mrb[0].mxu1 %vm323_vm1, %v5858_v58  ;;  %v6951_v58 = vld [vmem:[#allocation19_spill] sm:$0xff] }
  0xa0   : > { %4901 = vmatprep.mubr.msk.f32.mxu0 %vm323_vm1, %v5802_v61  ;;  %4680 = vmatprep.mubr.msk.f32.mxu1 %vm323_vm1, %v6948_v40  ;;  %v6957_v40 = vld [vmem:[#allocation25_spill] sm:$0xff] }
  0xa1   : > { %4726 = vmatpush3.msk.msra.mxu1 %vm420_vm0, %v5990_v14  ;;  %v6953_v14 = vld [vmem:[#allocation21_spill] sm:$0xff] }
  0xa2   : > { %5025 = vmatprep.subr.msk.mxu1 %vm420_vm0, %v6949_v49 }
  0xa3   : > { %4902 = vmatmul.mubr.msk.f32.gmra.mrb[16].mxu0 %vm323_vm1, %v5821_v12  ;;  %4681 = vmatmul.mubr.msk.f32.gmra.mrb[2].mxu1 %vm323_vm1, %v6950_v26  ;;  %v6958_v26 = vld [vmem:[#allocation27_spill] sm:$0xff] }
  0xa4   : > { %4904 = vmatprep.mubr.msk.f32.mxu0 %vm323_vm1, %v5830_v24  ;;  %4683 = vmatprep.mubr.msk.f32.mxu1 %vm323_vm1, %v6951_v58 }
  0xa7   : > { %4905 = vmatmul.mubr.msk.f32.gmra.mrb[18].mxu0 %vm323_vm1, %v5852_v45  ;;  %4684 = vmatmul.mubr.msk.f32.gmra.mrb[4].mxu1 %vm323_vm1, %v6952_v51 }
  0xa8   : > { %4907 = vmatprep.mubr.msk.f32.mxu0 %vm323_vm1, %v5864_v6  ;;  %4686 = vmatprep.mubr.msk.f32.mxu1 %vm323_vm1, %v6953_v14 }
  0xab   : > { %4908 = vmatmul.mubr.msk.f32.gmra.mrb[20].mxu0 %vm323_vm1, %v5880_v38  ;;  %4687 = vmatmul.mubr.msk.f32.gmra.mrb[6].mxu1 %vm323_vm1, %v6954_v53 }
  0xac   : > { %4910 = vmatprep.mubr.msk.f32.mxu0 %vm323_vm1, %v5887_v25  ;;  %4689 = vmatprep.mubr.msk.f32.mxu1 %vm323_vm1, %v6955_v1  ;;  %v6960_v25 = vld [vmem:[#allocation31_spill] sm:$0xff] }
  0xaf   : > { %4911 = vmatmul.mubr.msk.f32.gmra.mrb[22].mxu0 %vm323_vm1, %v5903_v18  ;;  %4690 = vmatmul.mubr.msk.f32.gmra.mrb[8].mxu1 %vm323_vm1, %v6956_v46  ;;  %v6959_v18 = vld [vmem:[#allocation29_spill] sm:$0xff] }
  0xb0   : > { %4913 = vmatprep.mubr.msk.f32.mxu0 %vm323_vm1, %v5910_v8  ;;  %4692 = vmatprep.mubr.msk.f32.mxu1 %vm323_vm1, %v6957_v40  ;;  %v6961_v8 = vld [vmem:[#allocation33_spill] sm:$0xff] }
  0xb3   : > { %4914 = vmatmul.mubr.msk.f32.gmra.mrb[24].mxu0 %vm323_vm1, %v5927_v44  ;;  %4693 = vmatmul.mubr.msk.f32.gmra.mrb[10].mxu1 %vm323_vm1, %v6958_v26  ;;  %v6341_v44 = vld [vmem:[%s5531_s21 + $0x198] sm:$0xff] }
  0xb4   : > { %4916 = vmatprep.mubr.msk.f32.mxu0 %vm323_vm1, %v5935_v4  ;;  %4695 = vmatprep.mubr.msk.f32.mxu1 %vm323_vm1, %v6959_v18  ;;  %v6962_v4 = vld [vmem:[#allocation35_spill] sm:$0xff] }
  0xb7   : > { %4917 = vmatmul.mubr.msk.f32.gmra.mrb[26].mxu0 %vm323_vm1, %v5951_v9  ;;  %4696 = vmatmul.mubr.msk.f32.gmra.mrb[12].mxu1 %vm323_vm1, %v6960_v25  ;;  %v6352_v9 = vld [vmem:[%s5531_s21 + $0x1a0] sm:$0xff] }
  0xb8   : > { %4919 = vmatprep.mubr.msk.f32.mxu0 %vm323_vm1, %v6093_v43  ;;  %4698 = vmatprep.mubr.msk.f32.mxu1 %vm323_vm1, %v6961_v8  ;;  %v6965_v8 = vld [vmem:[#allocation41_spill] sm:$0xff] }
  0xbb   : > { %4920 = vmatmul.mubr.msk.f32.gmra.mrb[28].mxu0 %vm323_vm1, %v6096_v32  ;;  %4699 = vmatmul.mubr.msk.f32.gmra.mrb[14].mxu1 %vm323_vm1, %v6962_v4  ;;  %v6963_v4 = vld [vmem:[#allocation40_spill] sm:$0xff] }
  0xbc   : > { %4922 = vmatprep.mubr.msk.f32.mxu0 %vm323_vm1, %v6341_v44  ;;  %4701 = vmatprep.mubr.msk.f32.mxu1 %vm323_vm1, %v5956_v29  ;;  %v6964_v29 = vld [vmem:[#allocation11_spill] sm:$0xff] }
  0xbf   : > { %4923 = vmatmul.mubr.msk.f32.gmra.mrb[30].mxu0 %vm323_vm1, %v6352_v9  ;;  %4702 = vmatmul.mubr.msk.f32.gmra.mrb[16].mxu1 %vm323_vm1, %v5972_v16  ;;  %v6966_v16 = vld [vmem:[#allocation13_spill] sm:$0xff] }
  0xc0   : > { %4927 = vmatprep.mubr.msk.f32.mxu0 %vm323_vm1, %v5603_v28  ;;  %4704 = vmatprep.mubr.msk.f32.mxu1 %vm323_vm1, %v5977_v52  ;;  %v6967_v28 = vld [vmem:[#allocation42_spill] sm:$0xff] }
  0xc1   : > { %v6968_v52 = vld [vmem:[#allocation14_spill] sm:$0xff] }
  0xc3   : > { %4928 = vmatmul.mubr.msk.f32.vlgmr.msra.gmra.mrb[0].mxu0 %vm323_vm1, %v5625_v33  ;;  %4705 = vmatmul.mubr.msk.f32.gmra.mrb[18].mxu1 %vm323_vm1, %v6963_v4  ;;  %v6969_v33 = vld [vmem:[#allocation43_spill] sm:$0xff] }
  0xc4   : > { %4976 = vmatpush3.msk.msra.mxu0 %vm420_vm0, %v6172_v60  ;;  %4930 = vmatprep.mubr.msk.f32.mxu0 %vm323_vm1, %v6964_v29  ;;  %v6970_v4 = vld [vmem:[#allocation15_spill] sm:$0xff]  ;;  %v6971_v60 = vld [vmem:[#allocation44_spill] sm:$0xff] }
  0xc5   : > { %4707 = vmatprep.mubr.msk.f32.mxu1 %vm323_vm1, %v6965_v8  ;;  %v6972_v29 = vld [vmem:[#allocation16_spill] sm:$0xff]  ;;  %v6973_v8 = vld [vmem:[#allocation45_spill] sm:$0xff] }
  0xc7   : > { %4931 = vmatmul.mubr.msk.f32.gmra.mrb[2].mxu0 %vm323_vm1, %v6966_v16  ;;  %4708 = vmatmul.mubr.msk.f32.gmra.mrb[20].mxu1 %vm323_vm1, %v6967_v28  ;;  %v6974_v16 = vld [vmem:[#allocation46_spill] sm:$0xff] }
  0xc8   : > { %4933 = vmatprep.mubr.msk.f32.mxu0 %vm323_vm1, %v6968_v52  ;;  %4710 = vmatprep.mubr.msk.f32.mxu1 %vm323_vm1, %v6969_v33  ;;  %v6975_v52 = vld [vmem:[#allocation47_spill] sm:$0xff] }
  0xcb   : > { %4934 = vmatmul.mubr.msk.f32.gmra.mrb[4].mxu0 %vm323_vm1, %v6970_v4  ;;  %4711 = vmatmul.mubr.msk.f32.gmra.mrb[22].mxu1 %vm323_vm1, %v6971_v60  ;;  %v6976_v4 = vld [vmem:[#allocation48_spill] sm:$0xff] }
  0xcc   : > { %4936 = vmatprep.mubr.msk.f32.mxu0 %vm323_vm1, %v6972_v29  ;;  %4713 = vmatprep.mubr.msk.f32.mxu1 %vm323_vm1, %v6973_v8  ;;  %v6977_v29 = vld [vmem:[#allocation49_spill] sm:$0xff] }
  0xcf   : > { %4937 = vmatmul.mubr.msk.f32.gmra.mrb[6].mxu0 %vm323_vm1, %v5707_v57  ;;  %4714 = vmatmul.mubr.msk.f32.gmra.mrb[24].mxu1 %vm323_vm1, %v6974_v16  ;;  %v6978_v57 = vld [vmem:[#allocation50_spill] sm:$0xff] }
  0xd0   : > { %4939 = vmatprep.mubr.msk.f32.mxu0 %vm323_vm1, %v5711_v59  ;;  %4716 = vmatprep.mubr.msk.f32.mxu1 %vm323_vm1, %v6975_v52  ;;  %v6979_v59 = vld [vmem:[#allocation52_spill] sm:$0xff] }
  0xd3   : > { %4940 = vmatmul.mubr.msk.f32.gmra.mrb[8].mxu0 %vm323_vm1, %v5733_v2  ;;  %4717 = vmatmul.mubr.msk.f32.gmra.mrb[26].mxu1 %vm323_vm1, %v6976_v4  ;;  %v6980_v2 = vld [vmem:[#allocation7_spill] sm:$0xff] }
  0xd4   : > { %4942 = vmatprep.mubr.msk.f32.mxu0 %vm323_vm1, %v5737_v7  ;;  %4719 = vmatprep.mubr.msk.f32.mxu1 %vm323_vm1, %v6977_v29  ;;  %v6981_v7 = vld [vmem:[#allocation8_spill] sm:$0xff] }
  0xd7   : > { %4943 = vmatmul.mubr.msk.f32.gmra.mrb[10].mxu0 %vm323_vm1, %v5753_v17  ;;  %4720 = vmatmul.mubr.msk.f32.gmra.mrb[28].mxu1 %vm323_vm1, %v6978_v57  ;;  %v6982_v17 = vld [vmem:[#allocation9_spill] sm:$0xff] }
  0xd8   : > { %4945 = vmatprep.mubr.msk.f32.mxu0 %vm323_vm1, %v5757_v22  ;;  %4722 = vmatprep.mubr.msk.f32.mxu1 %vm323_vm1, %v6111_v11 }
  0xdb   : > { %4946 = vmatmul.mubr.msk.f32.gmra.mrb[12].mxu0 %vm323_vm1, %v5771_v36  ;;  %4723 = vmatmul.mubr.msk.f32.gmra.mrb[30].mxu1 %vm323_vm1, %v6979_v59  ;;  %v2976_v36 = vrot.slane %v6352_v9, 1 }
  0xdc   : > { %4948 = vmatprep.mubr.msk.f32.mxu0 %vm323_vm1, %v6148_v13  ;;  %4727 = vmatprep.mubr.msk.f32.mxu1 %vm323_vm1, %v6980_v2  ;;  %v6479_v2 = vld [vmem:[%s5531_s21 + $0x1a8] sm:$0x3]  ;;  %s3963_s21 = sshll.u32 %s246_s10, 8 }
  0xdd   : > { %s6663_s22 = scalar_lea.vmem [#allocation3], %s3963_s21 }
  0xde   : > { %s3837_s26 = sshll.u32 %s6663_s22, 4  ;;  %s6766_s26 = int_to_ptr.vmem [resolvable:$true] %s3837_s26 }
  0xdf   : > { %4949 = vmatmul.mubr.msk.f32.gmra.mrb[14].mxu0 %vm323_vm1, %v6161_v37  ;;  %4728 = vmatmul.mubr.msk.f32.vlgmr.msra.gmra.mrb[0].mxu1 %vm323_vm1, %v6981_v7  ;;  %s5341_s6 = scalar_lea.vmem %s6766_s26, 4096  ;;  %p5348_p1 = scmp.lt.s32.totalorder %s6766_s26, %s5346_s8 }
  0xe0   : > { %4951 = vmatprep.mubr.msk.f32.mxu0 %vm323_vm1, %v6167_v62  ;;  %4730 = vmatprep.mubr.msk.f32.mxu1 %vm323_vm1, %v5550_v10  ;;  %v6983_v10 = vld [vmem:[#allocation10_spill] sm:$0xff]  ;;  %p5342_p12 = scmp.ne.s32.totalorder %s6766_s26, %s5341_s6  ;;  %p5349_p2 = scmp.lt.s32.totalorder %s5347_s9, %s5341_s6 }
  0xe1   : > { %5026 = vmatpush3.msk.msra.mxu1 %vm420_vm0, %v6949_v49 }
  0xe2   : > { %p5343_p13 = pnand %p5342_p12, %p5489_p4  ;;  %p5350_p3 = por %p5349_p2, %p5348_p1 }
  0xe3   : > { %4952 = vmatmul.mubr.msk.f32.gmra.mrb[16].mxu0 %vm323_vm1, %v6183_v35  ;;  %4731 = vmatmul.mubr.msk.f32.gmra.mrb[2].mxu1 %vm323_vm1, %v6982_v17 }
  0xe4   : > { %4954 = vmatprep.mubr.msk.f32.mxu0 %vm323_vm1, %v6189_v54  ;;  %4733 = vmatprep.mubr.msk.f32.mxu1 %vm323_vm1, %v5577_v20  ;;  %v6984_v20 = vld [vmem:[#allocation12_spill] sm:$0xff]  ;;  %p5344_p0 = pneg %p5343_p13 }
  0xe6   : > { %p5351_p5 = pnand %p5350_p3, %p5344_p0 }
  0xe7   : > { %4955 = vmatmul.mubr.msk.f32.gmra.mrb[18].mxu0 %vm323_vm1, %v6204_v3  ;;  %4734 = vmatmul.mubr.msk.f32.gmra.mrb[4].mxu1 %vm323_vm1, %v5584_v23  ;;  %v1972_v23 = vrot.slane %v6093_v43, 1 }
  0xe8   : > { %4957 = vmatprep.mubr.msk.f32.mxu0 %vm323_vm1, %v6208_v21  ;;  %4736 = vmatprep.mubr.msk.f32.mxu1 %vm323_vm1, %v5607_v30  ;;  %v1973_v30 = vrot.slane %v6096_v32, 1 }
  0xea   : > { %v6476_v49 = vsel %vm697_vm2, %v1972_v23, %v1973_v30 }
  0xeb   : > { %4958 = vmatmul.mubr.msk.f32.gmra.mrb[20].mxu0 %vm323_vm1, %v6221_v27  ;;  %4737 = vmatmul.mubr.msk.f32.gmra.mrb[6].mxu1 %vm323_vm1, %v6983_v10 }
  0xec   : > { %4960 = vmatprep.mubr.msk.f32.mxu0 %vm323_vm1, %v6225_v5  ;;  %4739 = vmatprep.mubr.msk.f32.mxu1 %vm323_vm1, %v5641_v39  ;;  %v6985_v39 = vld [vmem:[#allocation51_spill] sm:$0xff] }
  0xed   : > { %v1975_v22 = vrot.slane %v6985_v39, 1 }
  0xef   : > { %4961 = vmatmul.mubr.msk.f32.gmra.mrb[22].mxu0 %vm323_vm1, %v6238_v15  ;;  %4740 = vmatmul.mubr.msk.f32.gmra.mrb[8].mxu1 %vm323_vm1, %v6984_v20 }
  0xf0   : > { %4963 = vmatprep.mubr.msk.f32.mxu0 %vm323_vm1, %v6242_v34  ;;  %4742 = vmatprep.mubr.msk.f32.mxu1 %vm323_vm1, %v5667_v47  ;;  %v2975_v47 = vrot.slane %v6341_v44, 1 }
  0xf2   : > { %v2977_v7 = vsel %vm697_vm2, %v2975_v47, %v2976_v36 }
  0xf3   : > { %4964 = vmatmul.mubr.msk.f32.gmra.mrb[24].mxu0 %vm323_vm1, %v6255_v41  ;;  %4743 = vmatmul.mubr.msk.f32.gmra.mrb[10].mxu1 %vm323_vm1, %v5670_v48  ;;  %v6490_v48 = vsel %vm697_vm2, %v1973_v30, %v1975_v22 }
  0xf4   : > { %4966 = vmatprep.mubr.msk.f32.mxu0 %vm323_vm1, %v6259_v19  ;;  %4745 = vmatprep.mubr.msk.f32.mxu1 %vm323_vm1, %v5693_v55  ;;  %v2978_v55 = vrot.slane %v6479_v2, 1 }
  0xf7   : > { %4967 = vmatmul.mubr.msk.f32.gmra.mrb[26].mxu0 %vm323_vm1, %v6270_v31  ;;  %4746 = vmatmul.mubr.msk.f32.gmra.mrb[12].mxu1 %vm323_vm1, %v5696_v56  ;;  %v2979_v56 = vsel %vm697_vm2, %v2976_v36, %v2978_v55 }
  0xf8   : > { %4969 = vmatprep.mubr.msk.f32.mxu0 %vm323_vm1, %v6476_v49  ;;  %4748 = vmatprep.mubr.msk.f32.mxu1 %vm323_vm1, %v5719_v63  ;;  %v6986_v63 = vld [vmem:[#allocation26_spill] sm:$0xff] }
  0xfb   : > { %4970 = vmatmul.mubr.msk.f32.gmra.mrb[28].mxu0 %vm323_vm1, %v6490_v48  ;;  %4749 = vmatmul.mubr.msk.f32.gmra.mrb[14].mxu1 %vm323_vm1, %v5722_v0  ;;  %v6987_v0 = vld [vmem:[#allocation28_spill] sm:$0xff] }
  0xfc   : > { %4972 = vmatprep.mubr.msk.f32.mxu0 %vm323_vm1, %v2977_v7  ;;  %4751 = vmatprep.mubr.msk.f32.mxu1 %vm323_vm1, %v5777_v42  ;;  %v6989_v42 = vld [vmem:[#allocation32_spill] sm:$0xff] }
  0xff   : > { %4973 = vmatmul.mubr.msk.f32.gmra.mrb[30].mxu0 %vm323_vm1, %v2979_v56  ;;  %4752 = vmatmul.mubr.msk.f32.gmra.mrb[16].mxu1 %vm323_vm1, %v5793_v50  ;;  %v6990_v50 = vld [vmem:[#allocation33_spill] sm:$0xff] }
 0x100   : > { %4977 = vmatprep.mubr.msk.f32.mxu0 %vm323_vm1, %v6951_v58  ;;  %4754 = vmatprep.mubr.msk.f32.mxu1 %vm323_vm1, %v5802_v61  ;;  %v6991_v61 = vld [vmem:[#allocation34_spill] sm:$0xff]  ;;  %v6998_v58 = vld [vmem:[#allocation41_spill] sm:$0xff] }
 0x103   : > { %4978 = vmatmul.mubr.msk.f32.vlgmr.msra.gmra.mrb[0].mxu0 %vm323_vm1, %v6952_v51  ;;  %4755 = vmatmul.mubr.msk.f32.gmra.mrb[18].mxu1 %vm323_vm1, %v5821_v12  ;;  %v6992_v12 = vld [vmem:[#allocation35_spill] sm:$0xff] }
 0x104   : > { %4980 = vmatprep.mubr.msk.f32.mxu0 %vm323_vm1, %v6953_v14  ;;  %4757 = vmatprep.mubr.msk.f32.mxu1 %vm323_vm1, %v5830_v24  ;;  %v6993_v24 = vld [vmem:[#allocation36_spill] sm:$0xff] }
 0x107   : > { %4981 = vmatmul.mubr.msk.f32.gmra.mrb[2].mxu0 %vm323_vm1, %v6954_v53  ;;  %4758 = vmatmul.mubr.msk.f32.gmra.mrb[20].mxu1 %vm323_vm1, %v5852_v45  ;;  %v6994_v45 = vld [vmem:[#allocation37_spill] sm:$0xff] }
 0x108   : > { %4983 = vmatprep.mubr.msk.f32.mxu0 %vm323_vm1, %v6955_v1  ;;  %4760 = vmatprep.mubr.msk.f32.mxu1 %vm323_vm1, %v5864_v6  ;;  %v6988_v6 = vld [vmem:[#allocation30_spill] sm:$0xff] }
 0x10b   : > { %4984 = vmatmul.mubr.msk.f32.gmra.mrb[4].mxu0 %vm323_vm1, %v6956_v46  ;;  %4761 = vmatmul.mubr.msk.f32.gmra.mrb[22].mxu1 %vm323_vm1, %v5880_v38  ;;  %v6995_v38 = vld [vmem:[#allocation38_spill] sm:$0xff] }
 0x10c   : > { %4986 = vmatprep.mubr.msk.f32.mxu0 %vm323_vm1, %v6957_v40  ;;  %4763 = vmatprep.mubr.msk.f32.mxu1 %vm323_vm1, %v6986_v63  ;;  %v6648_v46 = vld [vmem:[%s6820_s2] ss:$0 sm:$0xff] }
 0x10f   : > { %4987 = vmatmul.mubr.msk.f32.gmra.mrb[6].mxu0 %vm323_vm1, %v6958_v26  ;;  %4764 = vmatmul.mubr.msk.f32.gmra.mrb[24].mxu1 %vm323_vm1, %v6987_v0 }
 0x110   : > { %4989 = vmatprep.mubr.msk.f32.mxu0 %vm323_vm1, %v6959_v18  ;;  %4766 = vmatprep.mubr.msk.f32.mxu1 %vm323_vm1, %v6988_v6  ;;  %v6997_v18 = vld [vmem:[#allocation40_spill] sm:$0xff] }
 0x113   : > { %4990 = vmatmul.mubr.msk.f32.gmra.mrb[8].mxu0 %vm323_vm1, %v6960_v25  ;;  %4767 = vmatmul.mubr.msk.f32.gmra.mrb[26].mxu1 %vm323_vm1, %v6989_v42  ;;  %v6996_v25 = vld [vmem:[#allocation39_spill] sm:$0xff] }
 0x114   : > { %4992 = vmatprep.mubr.msk.f32.mxu0 %vm323_vm1, %v6990_v50  ;;  %4769 = vmatprep.mubr.msk.f32.mxu1 %vm323_vm1, %v6991_v61 }
 0x117   : > { %4993 = vmatmul.mubr.msk.f32.gmra.mrb[10].mxu0 %vm323_vm1, %v6992_v12  ;;  %4770 = vmatmul.mubr.msk.f32.gmra.mrb[28].mxu1 %vm323_vm1, %v6993_v24 }
 0x118   : > { %4995 = vmatprep.mubr.msk.f32.mxu0 %vm323_vm1, %v6994_v45  ;;  %4772 = vmatprep.mubr.msk.f32.mxu1 %vm323_vm1, %v6093_v43  ;;  %v3310_v43 = vrot.slane %v6341_v44, 2 }
 0x11b   : > { %4996 = vmatmul.mubr.msk.f32.gmra.mrb[12].mxu0 %vm323_vm1, %v6995_v38  ;;  %4773 = vmatmul.mubr.msk.f32.gmra.mrb[30].mxu1 %vm323_vm1, %v6096_v32  ;;  %v6999_v32 = vld [vmem:[#allocation53_spill] sm:$0xff] }
 0x11c   : > { %4998 = vmatprep.mubr.msk.f32.mxu0 %vm323_vm1, %v6996_v25  ;;  %4801 = vmatprep.mubr.msk.f32.mxu1 %vm323_vm1, %v6148_v13  ;;  %v7000_v13 = vld [vmem:[#allocation54_spill] sm:$0xff] }
 0x11f   : > { %4999 = vmatmul.mubr.msk.f32.gmra.mrb[14].mxu0 %vm323_vm1, %v6997_v18  ;;  %4802 = vmatmul.mubr.msk.f32.vlgmr.msra.gmra.mrb[16].mxu1 %vm323_vm1, %v6161_v37 }
 0x120   : > { %5001 = vmatprep.mubr.msk.f32.mxu0 %vm323_vm1, %v6998_v58  ;;  %4804 = vmatprep.mubr.msk.f32.mxu1 %vm323_vm1, %v6167_v62 }
 0x123   : > { %5002 = vmatmul.mubr.msk.f32.gmra.mrb[16].mxu0 %vm323_vm1, %v6967_v28  ;;  %4805 = vmatmul.mubr.msk.f32.gmra.mrb[18].mxu1 %vm323_vm1, %v6183_v35  ;;  %v6653_v28 = vld [vmem:[%s6821_s3] ss:$0 sm:$0xff] }
 0x124   : > { %5004 = vmatprep.mubr.msk.f32.mxu0 %vm323_vm1, %v6969_v33  ;;  %4807 = vmatprep.mubr.msk.f32.mxu1 %vm323_vm1, %v6189_v54 }
 0x127   : > { %5005 = vmatmul.mubr.msk.f32.gmra.mrb[18].mxu0 %vm323_vm1, %v6971_v60  ;;  %4808 = vmatmul.mubr.msk.f32.gmra.mrb[20].mxu1 %vm323_vm1, %v6204_v3 }
 0x128   : > { %5007 = vmatprep.mubr.msk.f32.mxu0 %vm323_vm1, %v6973_v8  ;;  %4810 = vmatprep.mubr.msk.f32.mxu1 %vm323_vm1, %v6208_v21  ;;  %v3311_v8 = vrot.slane %v6352_v9, 2 }
 0x12a   : > { %v3312_v62 = vsel %vm1168_vm3, %v3310_v43, %v3311_v8 }
 0x12b   : > { %5008 = vmatmul.mubr.msk.f32.gmra.mrb[20].mxu0 %vm323_vm1, %v6974_v16  ;;  %4811 = vmatmul.mubr.msk.f32.gmra.mrb[22].mxu1 %vm323_vm1, %v6221_v27 }
 0x12c   : > { %5010 = vmatprep.mubr.msk.f32.mxu0 %vm323_vm1, %v6975_v52  ;;  %4813 = vmatprep.mubr.msk.f32.mxu1 %vm323_vm1, %v6225_v5 }
 0x12f   : > { %5011 = vmatmul.mubr.msk.f32.gmra.mrb[22].mxu0 %vm323_vm1, %v6976_v4  ;;  %4814 = vmatmul.mubr.msk.f32.gmra.mrb[24].mxu1 %vm323_vm1, %v6238_v15 }
 0x130   : > { %5013 = vmatprep.mubr.msk.f32.mxu0 %vm323_vm1, %v6977_v29  ;;  %4816 = vmatprep.mubr.msk.f32.mxu1 %vm323_vm1, %v6242_v34 }
 0x133   : > { %5014 = vmatmul.mubr.msk.f32.gmra.mrb[24].mxu0 %vm323_vm1, %v6978_v57  ;;  %4817 = vmatmul.mubr.msk.f32.gmra.mrb[26].mxu1 %vm323_vm1, %v6255_v41 }
 0x134   : > { %5016 = vmatprep.mubr.msk.f32.mxu0 %vm323_vm1, %v6111_v11  ;;  %4819 = vmatprep.mubr.msk.f32.mxu1 %vm323_vm1, %v6259_v19  ;;  %v3313_v11 = vrot.slane %v6479_v2, 2 }
 0x136   : > { %v3314_v44 = vsel %vm1168_vm3, %v3311_v8, %v3313_v11 }
 0x137   : > { %5017 = vmatmul.mubr.msk.f32.gmra.mrb[26].mxu0 %vm323_vm1, %v6979_v59  ;;  %4820 = vmatmul.mubr.msk.f32.gmra.mrb[28].mxu1 %vm323_vm1, %v6270_v31 }
 0x138   : > { %5019 = vmatprep.mubr.msk.f32.mxu0 %vm323_vm1, %v6999_v32  ;;  %4822 = vmatprep.mubr.msk.f32.mxu1 %vm323_vm1, %v6476_v49 }
 0x13b   : > { %5020 = vmatmul.mubr.msk.f32.gmra.mrb[28].mxu0 %vm323_vm1, %v7000_v13  ;;  %4823 = vmatmul.mubr.msk.f32.gmra.mrb[30].mxu1 %vm323_vm1, %v6490_v48 }
 0x13c   : > { %5022 = vmatprep.mubr.msk.f32.mxu0 %vm323_vm1, %v3312_v62 }
 0x13f   : > { %5023 = vmatmul.mubr.msk.f32.gmra.mrb[30].mxu0 %vm323_vm1, %v3314_v44 }
 0x1b2   : > { %v4729_v9 = vpop.f32.mrb[0].mxu1 }
 0x1b3   : > { %v1716_v37 = vpop.f32.mrb[1].mxu1 }
 0x1b6   : > { %v4732_v35 = vpop.f32.mrb[2].mxu1 }
 0x1b7   : > { %v1726_v54 = vpop.f32.mrb[3].mxu1 }
 0x1ba   : > { %v4735_v3 = vpop.f32.mrb[4].mxu1 }
 0x1bb   : > { %v1736_v21 = vpop.f32.mrb[5].mxu1 }
 0x1be   : > { %v4738_v27 = vpop.f32.mrb[6].mxu1 }
 0x1bf   : > { %v1746_v5 = vpop.f32.mrb[7].mxu1 }
 0x1c2   : > { %v4741_v15 = vpop.f32.mrb[8].mxu1 }
 0x1c3   : > { %v1756_v34 = vpop.f32.mrb[9].mxu1 }
 0x1c6   : > { %v6632_v41 = vpop.f32.mrb[10].mxu1 }
 0x1c7   : > { %v6634_v19 = vpop.f32.mrb[11].mxu1 }
 0x1ca   : > { %v6636_v31 = vpop.f32.mrb[12].mxu1 }
 0x1cb   : > { %v6638_v51 = vpop.f32.mrb[13].mxu1 }
 0x1ce   : > { %v6640_v14 = vpop.f32.mrb[14].mxu1 }
 0x1cf   : > { %v6642_v53 = vpop.f32.mrb[15].mxu1 }
 0x1d6   : > { %v4979_v1 = vpop.f32.mrb[0].mxu0 }
 0x1d7   : > { %v5027_v40 = vadd.f32 %v4979_v1, %v4729_v9  ;;  %v3390_v26 = vpop.f32.mrb[1].mxu0 }
 0x1d8   : > { %v5028_v33 = vadd.f32 %v3390_v26, %v1716_v37 }
 0x1d9   : > { %v3685_v60 = vmul.f32 %v5027_v40, %v6648_v46 }
 0x1da   : > { %v3684_v16 = vmul.f32 %v5028_v33, %v6648_v46  ;;  %v4982_v52 = vpop.f32.mrb[2].mxu0 }
 0x1db   : > { %v3724_v4 = vadd.f32 %v6653_v28, %v3685_v60  ;;  %v5029_v29 = vadd.f32 %v4982_v52, %v4732_v35  ;;  %v3400_v57 = vpop.f32.mrb[3].mxu0 }
 0x1dc   : > { %v3723_v59 = vadd.f32 %v6653_v28, %v3684_v16  ;;  %v5030_v17 = vadd.f32 %v3400_v57, %v1726_v54 }
 0x1dd   : > { %v3756_v10 = vmax.f32 %v3724_v4, 0.0  ;;  %v3687_v20 = vmul.f32 %v5029_v29, %v6648_v46 }
 0x1de   : > { %v3755_v23 = vmax.f32 %v3723_v59, 0.0  ;;  %v3686_v30 = vmul.f32 %v5030_v17, %v6648_v46  ;;  %v4985_v39 = vpop.f32.mrb[4].mxu0 }
 0x1df   : > { %3788 = vst [vmem:[%s6663_s22 + $0x8] sm:$0xff] %v3756_v10  ;;  %v3726_v22 = vadd.f32 %v6653_v28, %v3687_v20  ;;  %v5031_v47 = vadd.f32 %v4985_v39, %v4735_v3  ;;  %v3410_v36 = vpop.f32.mrb[5].mxu0 }
 0x1e0   : > { %3787 = vst [vmem:[%s6663_s22] sm:$0xff] %v3755_v23  ;;  %v3725_v49 = vadd.f32 %v6653_v28, %v3686_v30  ;;  %v5032_v2 = vadd.f32 %v3410_v36, %v1736_v21 }
 0x1e1   : > { %v3758_v48 = vmax.f32 %v3726_v22, 0.0  ;;  %v3689_v55 = vmul.f32 %v5031_v47, %v6648_v46 }
 0x1e2   : > { %v3757_v7 = vmax.f32 %v3725_v49, 0.0  ;;  %v3688_v56 = vmul.f32 %v5032_v2, %v6648_v46  ;;  %v4988_v63 = vpop.f32.mrb[6].mxu0 }
 0x1e3   : > { %3790 = vst [vmem:[%s6663_s22 + $0x18] sm:$0xff] %v3758_v48  ;;  %v3728_v0 = vadd.f32 %v6653_v28, %v3689_v55  ;;  %v5033_v6 = vadd.f32 %v4988_v63, %v4738_v27  ;;  %v3420_v42 = vpop.f32.mrb[7].mxu0 }
 0x1e4   : > { %3789 = vst [vmem:[%s6663_s22 + $0x10] sm:$0xff] %v3757_v7  ;;  %v3727_v50 = vadd.f32 %v6653_v28, %v3688_v56  ;;  %v5034_v61 = vadd.f32 %v3420_v42, %v1746_v5 }
 0x1e5   : > { %v3760_v12 = vmax.f32 %v3728_v0, 0.0  ;;  %v3691_v24 = vmul.f32 %v5033_v6, %v6648_v46 }
 0x1e6   : > { %v3759_v45 = vmax.f32 %v3727_v50, 0.0  ;;  %v3690_v38 = vmul.f32 %v5034_v61, %v6648_v46  ;;  %v4991_v25 = vpop.f32.mrb[8].mxu0 }
 0x1e7   : > { %3792 = vst [vmem:[%s6663_s22 + $0x28] sm:$0xff] %v3760_v12  ;;  %v3730_v18 = vadd.f32 %v6653_v28, %v3691_v24  ;;  %v5035_v58 = vadd.f32 %v4991_v25, %v4741_v15  ;;  %v3430_v43 = vpop.f32.mrb[9].mxu0 }
 0x1e8   : > { %3791 = vst [vmem:[%s6663_s22 + $0x20] sm:$0xff] %v3759_v45  ;;  %v3729_v8 = vadd.f32 %v6653_v28, %v3690_v38  ;;  %v5036_v32 = vadd.f32 %v3430_v43, %v1756_v34 }
 0x1e9   : > { %v3762_v11 = vmax.f32 %v3730_v18, 0.0  ;;  %v3693_v62 = vmul.f32 %v5035_v58, %v6648_v46 }
 0x1ea   : > { %v3761_v13 = vmax.f32 %v3729_v8, 0.0  ;;  %v3692_v44 = vmul.f32 %v5036_v32, %v6648_v46  ;;  %v4994_v9 = vpop.f32.mrb[10].mxu0 }
 0x1eb   : > { %3794 = vst [vmem:[%s6663_s22 + $0x38] sm:$0xff] %v3762_v11  ;;  %v3732_v37 = vadd.f32 %v6653_v28, %v3693_v62  ;;  %v5037_v35 = vadd.f32 %v4994_v9, %v6632_v41  ;;  %v3440_v54 = vpop.f32.mrb[11].mxu0 }
 0x1ec   : > { %3793 = vst [vmem:[%s6663_s22 + $0x30] sm:$0xff] %v3761_v13  ;;  %v3731_v3 = vadd.f32 %v6653_v28, %v3692_v44  ;;  %v5038_v21 = vadd.f32 %v3440_v54, %v6634_v19 }
 0x1ed   : > { %v3764_v27 = vmax.f32 %v3732_v37, 0.0  ;;  %v3695_v5 = vmul.f32 %v5037_v35, %v6648_v46 }
 0x1ee   : > { %v3763_v15 = vmax.f32 %v3731_v3, 0.0  ;;  %v3694_v34 = vmul.f32 %v5038_v21, %v6648_v46  ;;  %v4997_v1 = vpop.f32.mrb[12].mxu0 }
 0x1ef   : > { %3796 = vst [vmem:[%s6663_s22 + $0x48] sm:$0xff] %v3764_v27  ;;  %v3734_v40 = vadd.f32 %v6653_v28, %v3695_v5  ;;  %v5039_v26 = vadd.f32 %v4997_v1, %v6636_v31  ;;  %v3450_v41 = vpop.f32.mrb[13].mxu0 }
 0x1f0   : > { %3795 = vst [vmem:[%s6663_s22 + $0x40] sm:$0xff] %v3763_v15  ;;  %v3733_v33 = vadd.f32 %v6653_v28, %v3694_v34  ;;  %v5040_v19 = vadd.f32 %v3450_v41, %v6638_v51 }
 0x1f1   : > { %v3766_v60 = vmax.f32 %v3734_v40, 0.0  ;;  %v3697_v16 = vmul.f32 %v5039_v26, %v6648_v46 }
 0x1f2   : > { %v3765_v52 = vmax.f32 %v3733_v33, 0.0  ;;  %v3696_v4 = vmul.f32 %v5040_v19, %v6648_v46  ;;  %v5000_v29 = vpop.f32.mrb[14].mxu0  ;;  %v4803_v57 = vpop.f32.mrb[16].mxu1 }
 0x1f3   : > { %3798 = vst [vmem:[%s6663_s22 + $0x58] sm:$0xff] %v3766_v60  ;;  %v3736_v59 = vadd.f32 %v6653_v28, %v3697_v16  ;;  %v5041_v31 = vadd.f32 %v5000_v29, %v6640_v14  ;;  %v3460_v17 = vpop.f32.mrb[15].mxu0  ;;  %v2132_v10 = vpop.f32.mrb[17].mxu1 }
 0x1f4   : > { %3797 = vst [vmem:[%s6663_s22 + $0x50] sm:$0xff] %v3765_v52  ;;  %v3735_v51 = vadd.f32 %v6653_v28, %v3696_v4  ;;  %v5042_v20 = vadd.f32 %v3460_v17, %v6642_v53 }
 0x1f5   : > { %v3768_v23 = vmax.f32 %v3736_v59, 0.0  ;;  %v3699_v30 = vmul.f32 %v5041_v31, %v6648_v46 }
 0x1f6   : > { %v3767_v39 = vmax.f32 %v3735_v51, 0.0  ;;  %v3698_v22 = vmul.f32 %v5042_v20, %v6648_v46  ;;  %v5003_v47 = vpop.f32.mrb[16].mxu0  ;;  %v4806_v36 = vpop.f32.mrb[18].mxu1 }
 0x1f7   : > { %3800 = vst [vmem:[%s6663_s22 + $0x68] sm:$0xff] %v3768_v23  ;;  %v3738_v14 = vadd.f32 %v6653_v28, %v3699_v30  ;;  %v5043_v49 = vadd.f32 %v5003_v47, %v4803_v57  ;;  %v3470_v2 = vpop.f32.mrb[17].mxu0  ;;  %v2142_v48 = vpop.f32.mrb[19].mxu1 }
 0x1f8   : > { %3799 = vst [vmem:[%s6663_s22 + $0x60] sm:$0xff] %v3767_v39  ;;  %v3737_v55 = vadd.f32 %v6653_v28, %v3698_v22  ;;  %v5044_v53 = vadd.f32 %v3470_v2, %v2132_v10 }
 0x1f9   : > { %v3770_v7 = vmax.f32 %v3738_v14, 0.0  ;;  %v3701_v56 = vmul.f32 %v5043_v49, %v6648_v46 }
 0x1fa   : > { %v3769_v63 = vmax.f32 %v3737_v55, 0.0  ;;  %v3700_v0 = vmul.f32 %v5044_v53, %v6648_v46  ;;  %v5006_v6 = vpop.f32.mrb[18].mxu0  ;;  %v4809_v42 = vpop.f32.mrb[20].mxu1 }
 0x1fb   : > { %3802 = vst [vmem:[%s6663_s22 + $0x78] sm:$0xff] %v3770_v7  ;;  %v3740_v50 = vadd.f32 %v6653_v28, %v3701_v56  ;;  %v5045_v61 = vadd.f32 %v5006_v6, %v4806_v36  ;;  %v3480_v12 = vpop.f32.mrb[19].mxu0  ;;  %v2152_v24 = vpop.f32.mrb[21].mxu1 }
 0x1fc   : > { %3801 = vst [vmem:[%s6663_s22 + $0x70] sm:$0xff] %v3769_v63  ;;  %v3739_v45 = vadd.f32 %v6653_v28, %v3700_v0  ;;  %v5046_v38 = vadd.f32 %v3480_v12, %v2142_v48 }
 0x1fd   : > { %v3772_v25 = vmax.f32 %v3740_v50, 0.0  ;;  %v3703_v18 = vmul.f32 %v5045_v61, %v6648_v46 }
 0x1fe   : > { %v3771_v58 = vmax.f32 %v3739_v45, 0.0  ;;  %v3702_v43 = vmul.f32 %v5046_v38, %v6648_v46  ;;  %v5009_v8 = vpop.f32.mrb[20].mxu0  ;;  %v4812_v32 = vpop.f32.mrb[22].mxu1 }
 0x1ff   : > { %3804 = vst [vmem:[%s6663_s22 + $0x88] sm:$0xff] %v3772_v25  ;;  %v3742_v11 = vadd.f32 %v6653_v28, %v3703_v18  ;;  %v5047_v62 = vadd.f32 %v5009_v8, %v4809_v42  ;;  %v3490_v13 = vpop.f32.mrb[21].mxu0  ;;  %v2162_v44 = vpop.f32.mrb[23].mxu1 }
 0x200   : > { %3803 = vst [vmem:[%s6663_s22 + $0x80] sm:$0xff] %v3771_v58  ;;  %v3741_v9 = vadd.f32 %v6653_v28, %v3702_v43  ;;  %v5048_v37 = vadd.f32 %v3490_v13, %v2152_v24 }
 0x201   : > { %v3774_v35 = vmax.f32 %v3742_v11, 0.0  ;;  %v3705_v54 = vmul.f32 %v5047_v62, %v6648_v46 }
 0x202   : > { %v3773_v3 = vmax.f32 %v3741_v9, 0.0  ;;  %v3704_v21 = vmul.f32 %v5048_v37, %v6648_v46  ;;  %v5012_v27 = vpop.f32.mrb[22].mxu0  ;;  %v4815_v5 = vpop.f32.mrb[24].mxu1 }
 0x203   : > { %3806 = vst [vmem:[%s6663_s22 + $0x98] sm:$0xff] %v3774_v35  ;;  %v3744_v15 = vadd.f32 %v6653_v28, %v3705_v54  ;;  %v5049_v34 = vadd.f32 %v5012_v27, %v4812_v32  ;;  %v3500_v1 = vpop.f32.mrb[23].mxu0  ;;  %v2172_v40 = vpop.f32.mrb[25].mxu1 }
 0x204   : > { %3805 = vst [vmem:[%s6663_s22 + $0x90] sm:$0xff] %v3773_v3  ;;  %v3743_v26 = vadd.f32 %v6653_v28, %v3704_v21  ;;  %v5050_v41 = vadd.f32 %v3500_v1, %v2162_v44 }
 0x205   : > { %v3776_v33 = vmax.f32 %v3744_v15, 0.0  ;;  %v3707_v19 = vmul.f32 %v5049_v34, %v6648_v46 }
 0x206   : > { %v3775_v60 = vmax.f32 %v3743_v26, 0.0  ;;  %v3706_v16 = vmul.f32 %v5050_v41, %v6648_v46  ;;  %v5015_v52 = vpop.f32.mrb[24].mxu0  ;;  %v4818_v4 = vpop.f32.mrb[26].mxu1 }
 0x207   : > { %3808 = vst [vmem:[%s6663_s22 + $0xa8] sm:$0xff] %v3776_v33  ;;  %v3746_v29 = vadd.f32 %v6653_v28, %v3707_v19  ;;  %v5051_v57 = vadd.f32 %v5015_v52, %v4815_v5  ;;  %v3510_v59 = vpop.f32.mrb[25].mxu0  ;;  %v2182_v31 = vpop.f32.mrb[27].mxu1 }
 0x208   : > { %3807 = vst [vmem:[%s6663_s22 + $0xa0] sm:$0xff] %v3775_v60  ;;  %v3745_v17 = vadd.f32 %v6653_v28, %v3706_v16  ;;  %v5052_v10 = vadd.f32 %v3510_v59, %v2172_v40 }
 0x209   : > { %v3778_v51 = vmax.f32 %v3746_v29, 0.0  ;;  %v3709_v20 = vmul.f32 %v5051_v57, %v6648_v46 }
 0x20a   : > { %v3777_v23 = vmax.f32 %v3745_v17, 0.0  ;;  %v3708_v30 = vmul.f32 %v5052_v10, %v6648_v46  ;;  %v5018_v39 = vpop.f32.mrb[26].mxu0  ;;  %v4821_v22 = vpop.f32.mrb[28].mxu1 }
 0x20b   : > { %3810 = vst [vmem:[%s6663_s22 + $0xb8] sm:$0xff] %v3778_v51  ;;  %v3748_v47 = vadd.f32 %v6653_v28, %v3709_v20  ;;  %v5053_v36 = vadd.f32 %v5018_v39, %v4818_v4  ;;  %v3520_v14 = vpop.f32.mrb[27].mxu0  ;;  %v2192_v49 = vpop.f32.mrb[29].mxu1 }
 0x20c   : > { %3809 = vst [vmem:[%s6663_s22 + $0xb0] sm:$0xff] %v3777_v23  ;;  %v3747_v2 = vadd.f32 %v6653_v28, %v3708_v30  ;;  %v5054_v48 = vadd.f32 %v3520_v14, %v2182_v31 }
 0x20d   : > { %v3780_v55 = vmax.f32 %v3748_v47, 0.0  ;;  %v3711_v53 = vmul.f32 %v5053_v36, %v6648_v46 }
 0x20e   : > { %v3779_v7 = vmax.f32 %v3747_v2, 0.0  ;;  %v3710_v56 = vmul.f32 %v5054_v48, %v6648_v46  ;;  %v5021_v63 = vpop.f32.mrb[28].mxu0  ;;  %v4824_v0 = vpop.f32.mrb[30].mxu1 }
 0x20f   : > { %3812 = vst [vmem:[%s6663_s22 + $0xc8] sm:$0xff] %v3780_v55  ;;  %v3750_v6 = vadd.f32 %v6653_v28, %v3711_v53  ;;  %v5055_v42 = vadd.f32 %v5021_v63, %v4821_v22  ;;  %v3530_v50 = vpop.f32.mrb[29].mxu0  ;;  %v2202_v61 = vpop.f32.mrb[31].mxu1 }
 0x210   : > { %3811 = vst [vmem:[%s6663_s22 + $0xc0] sm:$0xff] %v3779_v7  ;;  %v3749_v12 = vadd.f32 %v6653_v28, %v3710_v56  ;;  %v5056_v24 = vadd.f32 %v3530_v50, %v2192_v49 }
 0x211   : > { %v3782_v45 = vmax.f32 %v3750_v6, 0.0  ;;  %v3713_v38 = vmul.f32 %v5055_v42, %v6648_v46 }
 0x212   : > { %v3781_v25 = vmax.f32 %v3749_v12, 0.0  ;;  %v3712_v18 = vmul.f32 %v5056_v24, %v6648_v46  ;;  %v5024_v58 = vpop.f32.mrb[30].mxu0 }
 0x213   : > { %3814 = vst [vmem:[%s6663_s22 + $0xd8] sm:$0xff] %v3782_v45  ;;  %v3752_v43 = vadd.f32 %v6653_v28, %v3713_v38  ;;  %v5057_v8 = vadd.f32 %v5024_v58, %v4824_v0  ;;  %v3540_v32 = vpop.f32.mrb[31].mxu0 }
 0x214   : > { %3813 = vst [vmem:[%s6663_s22 + $0xd0] sm:$0xff] %v3781_v25  ;;  %v3751_v11 = vadd.f32 %v6653_v28, %v3712_v18  ;;  %v5058_v62 = vadd.f32 %v3540_v32, %v2202_v61 }
 0x215   : > { %v3784_v13 = vmax.f32 %v3752_v43, 0.0  ;;  %v3715_v44 = vmul.f32 %v5057_v8, %v6648_v46 }
 0x216   : > { %v3783_v9 = vmax.f32 %v3751_v11, 0.0  ;;  %v3714_v37 = vmul.f32 %v5058_v62, %v6648_v46 }
 0x217   : > { %3816 = vst [vmem:[%s6663_s22 + $0xe8] sm:$0xff] %v3784_v13  ;;  %v3754_v35 = vadd.f32 %v6653_v28, %v3715_v44 }
 0x218   : > { %3815 = vst [vmem:[%s6663_s22 + $0xe0] sm:$0xff] %v3783_v9  ;;  %v3753_v54 = vadd.f32 %v6653_v28, %v3714_v37 }
 0x219   : > { %v3786_v3 = vmax.f32 %v3754_v35, 0.0 }
 0x21a   : > { %v3785_v46 = vmax.f32 %v3753_v54, 0.0 }
 0x21b   : > { %3818 = vst [vmem:[%s6663_s22 + $0xf8] sm:$0xff] %v3786_v3 }
 0x21c   : > { %3817 = vst [vmem:[%s6663_s22 + $0xf0] sm:$0xff] %v3785_v46 }
 0x21d   : > { %5354 = shalt.err (!%p5351_p5)
}
 0x21e   : > { %s5355_s10 = scalar_lea.hbm %s6764_s5, 4096  ;;  %s5359_s13 = scalar_lea.hbm %s6822_s4, 8192 }
 0x21f   : > { %p5356_p6 = scmp.ne.s32.totalorder %s6764_s5, %s5355_s10  ;;  %p5360_p10 = scmp.lt.u32.totalorder %s6764_s5, %s6822_s4 }
 0x220   : > { %p5361_p11 = scmp.lt.u32.totalorder %s5359_s13, %s5355_s10  ;;  %p5363_p13 = scmp.lt.u32.totalorder %s5355_s10, %s6764_s5 }
 0x221   : > { %p5357_p7 = pnand %p5356_p6, %p5489_p4 }
 0x222   : > { %p5362_p12 = por %p5361_p11, %p5360_p10 }
 0x223   : > { %p5358_p9 = pneg %p5357_p7 }
 0x224   : > { %p5364_p0 = por %p5363_p13, %p5362_p12 }
 0x226   : > { %p5365_p1 = pnand %p5364_p0, %p5358_p9 }
 0x228   : > { %5368 = shalt.err (!%p5365_p1)
}
 0x229   : > { %s5422_s22 = smov 128   ;;  %s5423_s24 = smov 8  }
 0x22a   : > { %5284 = dma.vmem_to_hbm [thread:$0]  (%p5489_p4), %s6766_s26, 4096, %s6764_s5, %s6772_s18, %s5422_s22, %s5422_s22, %s5423_s24  }
 0x22b PF: > { %p5290_p2 = scmp.ge.s32.totalorder %s5419_s20, 2  ;;  %s3852_s29 = sand.u32 1, %s5399_s15  }
 0x22c   : > { %s3853_s30 = scalar_lea.sflag [#allocation4], %s3852_s29 }
 0x22d   : > { %p5287_p3 = pnand %p5290_p2, %p5496_p8 }
 0x22f   : > { %5394 = dma.done.wait (!%p5287_p3), %s3853_s30, 4096  }
 0x230   : > { %5396 = vsyncadd (!%p5287_p3), %s3853_s30, 4294963200  ;;  %s17_s20 = sadd.s32 1, %s5419_s20   ;;  %s7001_s15 = smov %s5403_s16 }
 0x231   : > { %p14_p5 = scmp.ge.s32.totalorder %s17_s20, 4   ;;  %s7002_s16 = smov %s5407_s17 }
 0x232   : > { %s7003_s17 = smov %s5502_s28  ;;  %s7004_s18 = smov %s5415_s19 }
 0x233   : > { %s7005_s19 = smov %s7007_s23  ;;  %16 = sbr.rel (!%p14_p5) target bundleno = 4 (0x4), region = 89 }
 0x23a   :  { %3858 = vsyncpa [#allocation4], 1 }
 0x23b   :  { %3860 = vsyncpa [#allocation4 + $0x1], 1 }

</bundles_post_ra>
